<compile_context>
chip_gen: v5e
topology: v5e:2x2
jax: 0.10.0
libtpu: 0.0.40
codegen_flags: <defaults>
</compile_context>

<pallas_src>
import jax
import jax.numpy as jnp
from jax.experimental import pallas as pl
from jax.experimental.pallas import tpu as pltpu

HIDDEN_DIM = 32
INPUT_DIM = 1
NUM_LAYERS = 2
OUTPUT_DIM = 1


def _lstm_kernel(x_ref,      # (T, Bp, D_in)  time-major input, VMEM
                 wih0_ref,   # (D_in, 4H) == (1, 4H)   (D_in = 1)
                 b0_ref,     # (1, 4H)   b_ih_l0 + b_hh_l0
                 wf_ref,     # (H, 8H)   fused [W_hh_l0 | W_ih_l1]
                 whh1_ref,   # (H, 4H)
                 b1_ref,     # (1, 4H)   b_ih_l1 + b_hh_l1
                 wfc_ref,    # (H, O)
                 bfc_ref,    # (1, O)
                 out_ref):   # (Bp, O)
    T, Bp, _ = x_ref.shape
    H = whh1_ref.shape[0]
    H4 = 4 * H

    # ---- hoisted, loop-invariant work --------------------------------------
    # Layer-0 input projection for ALL timesteps. D_in == 1, so x @ W_ih_l0 is
    # an outer product: one lane-dense VPU broadcast-multiply, not an MXU op.
    # Layer-0 bias is folded in here too.
    xg = (x_ref[...] * wih0_ref[...].reshape(1, 1, H4)
          + b0_ref[...].reshape(1, 1, H4))                    # (T, Bp, 4H)
    b1b = jnp.broadcast_to(b1_ref[...], (Bp, H4))             # hoisted broadcast
    wf = wf_ref[...]                                          # (H, 8H)
    whh1 = whh1_ref[...]                                      # (H, 4H)

    def gates_to_hc(gates, c_prev):
        # 2 wide EUP pushes per cell: one sigmoid + one tanh over all 4H lanes,
        # then slice out i/f/g/o (PyTorch gate order i, f, g, o).
        sg = jax.nn.sigmoid(gates)
        th = jnp.tanh(gates)
        i = sg[:, 0 * H:1 * H]
        f = sg[:, 1 * H:2 * H]
        g = th[:, 2 * H:3 * H]
        o = sg[:, 3 * H:4 * H]
        c_new = f * c_prev + i * g
        h_new = o * jnp.tanh(c_new)
        return h_new, c_new

    # State lives in vregs carried through the (fully unrolled) loop.
    z = jnp.zeros((Bp, H), jnp.float32)
    h0, c0, h1, c1 = z, z, z, z
    # p0 carries h0(t-1) @ W_hh_l0; zero because h0(-1) == 0.
    p0 = jnp.zeros((Bp, H4), jnp.float32)

    for t in range(T):  # T is static -> full unroll, constant indices.
        # Layer 0: gates = x(t)@W_ih_l0 + b0 (precomputed) + h0(t-1)@W_hh_l0.
        h0, c0 = gates_to_hc(xg[t] + p0, c0)
        # Fused shared-LHS matmul: h0(t) @ [W_hh_l0 | W_ih_l1] -> (Bp, 8H).
        # One 256-lane MXU push feeds both layer-1 at t and layer-0 at t+1.
        fused = jnp.dot(h0, wf, preferred_element_type=jnp.float32)
        p0 = fused[:, :H4]                       # -> layer 0, step t+1
        # Layer 1.
        gates1 = (fused[:, H4:]
                  + jnp.dot(h1, whh1, preferred_element_type=jnp.float32)
                  + b1b)
        h1, c1 = gates_to_hc(gates1, c1)

    # fc(out[:, -1, :])  == fc on the last top-layer hidden state.
    out_ref[...] = (jnp.dot(h1, wfc_ref[...], preferred_element_type=jnp.float32)
                    + bfc_ref[...])


@jax.jit
def lstm_forward(x, params):
    """x: (B, T, INPUT_DIM) f32 (batch_first).  Returns (B, OUTPUT_DIM) f32."""
    B, T, D = x.shape
    Bp = ((B + 7) // 8) * 8                       # pad batch to sublane granule
    x_tm = jnp.transpose(x, (1, 0, 2))            # (T, B, D) time-major
    x_tm = jnp.pad(x_tm, ((0, 0), (0, Bp - B), (0, 0)))

    # Fuse the two shared-LHS recurrent weights into one 256-lane RHS.
    wf = jnp.concatenate([params["whh0"], params["wih1"]], axis=1)  # (H, 8H)

    vmem = pl.BlockSpec(memory_space=pltpu.MemorySpace.VMEM)
    out = pl.pallas_call(
        _lstm_kernel,
        out_shape=jax.ShapeDtypeStruct((Bp, OUTPUT_DIM), jnp.float32),
        in_specs=[vmem] * 8,
        out_specs=vmem,
    )(x_tm,
      params["wih0"], params["b0"], wf,
      params["whh1"], params["b1"],
      params["wfc"], params["bfc"])
    return out[:B]


def init_params(key):
    """Deterministic parameter init mirroring nn.LSTM / nn.Linear shapes."""
    H, D, O = HIDDEN_DIM, INPUT_DIM, OUTPUT_DIM
    k = 1.0 / jnp.sqrt(H)
    keys = jax.random.split(key, 10)

    def u(kk, shape):
        return jax.random.uniform(kk, shape, jnp.float32, -k, k)

    # PyTorch stores weight_ih_l* as (4H, in); we keep the transposed (in, 4H)
    # orientation for x @ W matmuls. Gate order i, f, g, o.
    w_ih_l0 = u(keys[0], (4 * H, D))
    w_hh_l0 = u(keys[1], (4 * H, H))
    b_ih_l0 = u(keys[2], (4 * H,))
    b_hh_l0 = u(keys[3], (4 * H,))
    w_ih_l1 = u(keys[4], (4 * H, H))
    w_hh_l1 = u(keys[5], (4 * H, H))
    b_ih_l1 = u(keys[6], (4 * H,))
    b_hh_l1 = u(keys[7], (4 * H,))
    w_fc = u(keys[8], (O, H))
    b_fc = u(keys[9], (O,))

    return {
        "wih0": w_ih_l0.T,                       # (D, 4H)
        "whh0": w_hh_l0.T,                       # (H, 4H)
        "b0": (b_ih_l0 + b_hh_l0)[None, :],      # (1, 4H)
        "wih1": w_ih_l1.T,                       # (H, 4H)
        "whh1": w_hh_l1.T,                       # (H, 4H)
        "b1": (b_ih_l1 + b_hh_l1)[None, :],      # (1, 4H)
        "wfc": w_fc.T,                           # (H, O)
        "bfc": b_fc[None, :],                    # (1, O)
    }


def lstm_reference(x, params):
    """Pure-JAX reference of the same forward pass (for validation)."""
    B, T, D = x.shape
    H = HIDDEN_DIM

    def cell(x_t, h, c, wih, whh, b):
        gates = x_t @ wih + h @ whh + b
        i = jax.nn.sigmoid(gates[:, 0 * H:1 * H])
        f = jax.nn.sigmoid(gates[:, 1 * H:2 * H])
        g = jnp.tanh(gates[:, 2 * H:3 * H])
        o = jax.nn.sigmoid(gates[:, 3 * H:4 * H])
        c = f * c + i * g
        h = o * jnp.tanh(c)
        return h, c

    h0 = c0 = h1 = c1 = jnp.zeros((B, H), jnp.float32)
    for t in range(T):
        h0, c0 = cell(x[:, t, :], h0, c0, params["wih0"], params["whh0"], params["b0"])
        h1, c1 = cell(h0, h1, c1, params["wih1"], params["whh1"], params["b1"])
    return h1 @ params["wfc"] + params["bfc"]


if __name__ == "__main__":
    key = jax.random.PRNGKey(0)
    kx, kp = jax.random.split(key)

    B, T = 2, 8
    x = jax.random.normal(kx, (B, T, INPUT_DIM), jnp.float32)
    params = init_params(kp)

    out = lstm_forward(x, params)
    out = jax.block_until_ready(out)

    ref = lstm_reference(x, params)
    assert out.shape == (B, OUTPUT_DIM)
    assert jnp.allclose(out, ref, atol=1e-5, rtol=1e-5), (out, ref)

    print("KERNEL_OK")
</pallas_src>

<mosaic_0001>
module attributes {stable_mosaic.version = 11 : i64} {
  func.func @_lstm_kernel(%arg0: memref<8x8x1xf32, #tpu.memory_space<vmem>>, %arg1: memref<1x128xf32, #tpu.memory_space<vmem>>, %arg2: memref<1x128xf32, #tpu.memory_space<vmem>>, %arg3: memref<32x256xf32, #tpu.memory_space<vmem>>, %arg4: memref<32x128xf32, #tpu.memory_space<vmem>>, %arg5: memref<1x128xf32, #tpu.memory_space<vmem>>, %arg6: memref<32x1xf32, #tpu.memory_space<vmem>>, %arg7: memref<1x1xf32, #tpu.memory_space<vmem>>, %arg8: memref<8x1xf32, #tpu.memory_space<vmem>>) attributes {dimension_semantics = [], scalar_prefetch = 0 : i64, scratch_operands = 0 : i64, tpu.core_type = #tpu.core_type<tc>} {
    %c0 = arith.constant 0 : index
    %c0_0 = arith.constant 0 : index
    %c0_1 = arith.constant 0 : index
    %0 = vector.load %arg0[%c0, %c0_0, %c0_1] : memref<8x8x1xf32, #tpu.memory_space<vmem>>, vector<8x8x1xf32>
    %c0_2 = arith.constant 0 : index
    %c0_3 = arith.constant 0 : index
    %1 = vector.load %arg1[%c0_2, %c0_3] : memref<1x128xf32, #tpu.memory_space<vmem>>, vector<1x128xf32>
    %2 = vector.shape_cast %1 : vector<1x128xf32> to vector<1x1x128xf32>
    %3 = vector.broadcast %0 : vector<8x8x1xf32> to vector<8x8x128xf32>
    %4 = vector.broadcast %2 : vector<1x1x128xf32> to vector<8x8x128xf32>
    %5 = arith.mulf %3, %4 : vector<8x8x128xf32>
    %c0_4 = arith.constant 0 : index
    %c0_5 = arith.constant 0 : index
    %6 = vector.load %arg2[%c0_4, %c0_5] : memref<1x128xf32, #tpu.memory_space<vmem>>, vector<1x128xf32>
    %7 = vector.shape_cast %6 : vector<1x128xf32> to vector<1x1x128xf32>
    %8 = vector.broadcast %7 : vector<1x1x128xf32> to vector<8x8x128xf32>
    %9 = arith.addf %5, %8 : vector<8x8x128xf32>
    %c0_6 = arith.constant 0 : index
    %c0_7 = arith.constant 0 : index
    %10 = vector.load %arg5[%c0_6, %c0_7] : memref<1x128xf32, #tpu.memory_space<vmem>>, vector<1x128xf32>
    %11 = vector.shape_cast %10 : vector<1x128xf32> to vector<1x128xf32>
    %12 = vector.broadcast %11 : vector<1x128xf32> to vector<8x128xf32>
    %c0_8 = arith.constant 0 : index
    %c0_9 = arith.constant 0 : index
    %13 = vector.load %arg3[%c0_8, %c0_9] : memref<32x256xf32, #tpu.memory_space<vmem>>, vector<32x256xf32>
    %c0_10 = arith.constant 0 : index
    %c0_11 = arith.constant 0 : index
    %14 = vector.load %arg4[%c0_10, %c0_11] : memref<32x128xf32, #tpu.memory_space<vmem>>, vector<32x128xf32>
    %cst = arith.constant 0.000000e+00 : f32
    %15 = vector.broadcast %cst : f32 to vector<8x32xf32>
    %cst_12 = arith.constant 0.000000e+00 : f32
    %16 = vector.broadcast %cst_12 : f32 to vector<8x128xf32>
    %17 = vector.extract_strided_slice %9 {offsets = [0, 0, 0], sizes = [1, 8, 128], strides = [1, 1, 1]} : vector<8x8x128xf32> to vector<1x8x128xf32>
    %18 = vector.shape_cast %17 : vector<1x8x128xf32> to vector<8x128xf32>
    %19 = arith.addf %18, %16 : vector<8x128xf32>
    %20 = arith.negf %19 : vector<8x128xf32>
    %21 = math.exp %20 : vector<8x128xf32>
    %cst_13 = arith.constant 1.000000e+00 : f32
    %22 = vector.broadcast %cst_13 : f32 to vector<8x128xf32>
    %23 = arith.addf %22, %21 : vector<8x128xf32>
    %24 = arith.divf %22, %23 : vector<8x128xf32>
    %25 = math.tanh %19 : vector<8x128xf32>
    %26 = vector.extract_strided_slice %24 {offsets = [0, 0], sizes = [8, 32], strides = [1, 1]} : vector<8x128xf32> to vector<8x32xf32>
    %27 = vector.extract_strided_slice %24 {offsets = [0, 32], sizes = [8, 32], strides = [1, 1]} : vector<8x128xf32> to vector<8x32xf32>
    %28 = vector.extract_strided_slice %25 {offsets = [0, 64], sizes = [8, 32], strides = [1, 1]} : vector<8x128xf32> to vector<8x32xf32>
    %29 = vector.extract_strided_slice %24 {offsets = [0, 96], sizes = [8, 32], strides = [1, 1]} : vector<8x128xf32> to vector<8x32xf32>
    %30 = arith.mulf %27, %15 : vector<8x32xf32>
    %31 = arith.mulf %26, %28 : vector<8x32xf32>
    %32 = arith.addf %30, %31 : vector<8x32xf32>
    %33 = math.tanh %32 : vector<8x32xf32>
    %34 = arith.mulf %29, %33 : vector<8x32xf32>
    %cst_14 = arith.constant dense<0.000000e+00> : vector<8x256xf32>
    %35 = tpu.matmul %34, %13, %cst_14 {dimension_numbers = #tpu.dot_dimension_numbers<[1], [0], [0], [1], [0, 0, 1, 1], [], []>} : vector<8x32xf32>, vector<32x256xf32>, vector<8x256xf32> -> vector<8x256xf32>
    %36 = vector.extract_strided_slice %35 {offsets = [0, 0], sizes = [8, 128], strides = [1, 1]} : vector<8x256xf32> to vector<8x128xf32>
    %37 = vector.extract_strided_slice %35 {offsets = [0, 128], sizes = [8, 128], strides = [1, 1]} : vector<8x256xf32> to vector<8x128xf32>
    %cst_15 = arith.constant dense<0.000000e+00> : vector<8x128xf32>
    %38 = tpu.matmul %15, %14, %cst_15 {dimension_numbers = #tpu.dot_dimension_numbers<[1], [0], [0], [1], [0, 0, 1, 1], [], []>} : vector<8x32xf32>, vector<32x128xf32>, vector<8x128xf32> -> vector<8x128xf32>
    %39 = arith.addf %37, %38 : vector<8x128xf32>
    %40 = arith.addf %39, %12 : vector<8x128xf32>
    %41 = arith.negf %40 : vector<8x128xf32>
    %42 = math.exp %41 : vector<8x128xf32>
    %cst_16 = arith.constant 1.000000e+00 : f32
    %43 = vector.broadcast %cst_16 : f32 to vector<8x128xf32>
    %44 = arith.addf %43, %42 : vector<8x128xf32>
    %45 = arith.divf %43, %44 : vector<8x128xf32>
    %46 = math.tanh %40 : vector<8x128xf32>
    %47 = vector.extract_strided_slice %45 {offsets = [0, 0], sizes = [8, 32], strides = [1, 1]} : vector<8x128xf32> to vector<8x32xf32>
    %48 = vector.extract_strided_slice %45 {offsets = [0, 32], sizes = [8, 32], strides = [1, 1]} : vector<8x128xf32> to vector<8x32xf32>
    %49 = vector.extract_strided_slice %46 {offsets = [0, 64], sizes = [8, 32], strides = [1, 1]} : vector<8x128xf32> to vector<8x32xf32>
    %50 = vector.extract_strided_slice %45 {offsets = [0, 96], sizes = [8, 32], strides = [1, 1]} : vector<8x128xf32> to vector<8x32xf32>
    %51 = arith.mulf %48, %15 : vector<8x32xf32>
    %52 = arith.mulf %47, %49 : vector<8x32xf32>
    %53 = arith.addf %51, %52 : vector<8x32xf32>
    %54 = math.tanh %53 : vector<8x32xf32>
    %55 = arith.mulf %50, %54 : vector<8x32xf32>
    %56 = vector.extract_strided_slice %9 {offsets = [1, 0, 0], sizes = [1, 8, 128], strides = [1, 1, 1]} : vector<8x8x128xf32> to vector<1x8x128xf32>
    %57 = vector.shape_cast %56 : vector<1x8x128xf32> to vector<8x128xf32>
    %58 = arith.addf %57, %36 : vector<8x128xf32>
    %59 = arith.negf %58 : vector<8x128xf32>
    %60 = math.exp %59 : vector<8x128xf32>
    %cst_17 = arith.constant 1.000000e+00 : f32
    %61 = vector.broadcast %cst_17 : f32 to vector<8x128xf32>
    %62 = arith.addf %61, %60 : vector<8x128xf32>
    %63 = arith.divf %61, %62 : vector<8x128xf32>
    %64 = math.tanh %58 : vector<8x128xf32>
    %65 = vector.extract_strided_slice %63 {offsets = [0, 0], sizes = [8, 32], strides = [1, 1]} : vector<8x128xf32> to vector<8x32xf32>
    %66 = vector.extract_strided_slice %63 {offsets = [0, 32], sizes = [8, 32], strides = [1, 1]} : vector<8x128xf32> to vector<8x32xf32>
    %67 = vector.extract_strided_slice %64 {offsets = [0, 64], sizes = [8, 32], strides = [1, 1]} : vector<8x128xf32> to vector<8x32xf32>
    %68 = vector.extract_strided_slice %63 {offsets = [0, 96], sizes = [8, 32], strides = [1, 1]} : vector<8x128xf32> to vector<8x32xf32>
    %69 = arith.mulf %66, %32 : vector<8x32xf32>
    %70 = arith.mulf %65, %67 : vector<8x32xf32>
    %71 = arith.addf %69, %70 : vector<8x32xf32>
    %72 = math.tanh %71 : vector<8x32xf32>
    %73 = arith.mulf %68, %72 : vector<8x32xf32>
    %cst_18 = arith.constant dense<0.000000e+00> : vector<8x256xf32>
    %74 = tpu.matmul %73, %13, %cst_18 {dimension_numbers = #tpu.dot_dimension_numbers<[1], [0], [0], [1], [0, 0, 1, 1], [], []>} : vector<8x32xf32>, vector<32x256xf32>, vector<8x256xf32> -> vector<8x256xf32>
    %75 = vector.extract_strided_slice %74 {offsets = [0, 0], sizes = [8, 128], strides = [1, 1]} : vector<8x256xf32> to vector<8x128xf32>
    %76 = vector.extract_strided_slice %74 {offsets = [0, 128], sizes = [8, 128], strides = [1, 1]} : vector<8x256xf32> to vector<8x128xf32>
    %cst_19 = arith.constant dense<0.000000e+00> : vector<8x128xf32>
    %77 = tpu.matmul %55, %14, %cst_19 {dimension_numbers = #tpu.dot_dimension_numbers<[1], [0], [0], [1], [0, 0, 1, 1], [], []>} : vector<8x32xf32>, vector<32x128xf32>, vector<8x128xf32> -> vector<8x128xf32>
    %78 = arith.addf %76, %77 : vector<8x128xf32>
    %79 = arith.addf %78, %12 : vector<8x128xf32>
    %80 = arith.negf %79 : vector<8x128xf32>
    %81 = math.exp %80 : vector<8x128xf32>
    %cst_20 = arith.constant 1.000000e+00 : f32
    %82 = vector.broadcast %cst_20 : f32 to vector<8x128xf32>
    %83 = arith.addf %82, %81 : vector<8x128xf32>
    %84 = arith.divf %82, %83 : vector<8x128xf32>
    %85 = math.tanh %79 : vector<8x128xf32>
    %86 = vector.extract_strided_slice %84 {offsets = [0, 0], sizes = [8, 32], strides = [1, 1]} : vector<8x128xf32> to vector<8x32xf32>
    %87 = vector.extract_strided_slice %84 {offsets = [0, 32], sizes = [8, 32], strides = [1, 1]} : vector<8x128xf32> to vector<8x32xf32>
    %88 = vector.extract_strided_slice %85 {offsets = [0, 64], sizes = [8, 32], strides = [1, 1]} : vector<8x128xf32> to vector<8x32xf32>
    %89 = vector.extract_strided_slice %84 {offsets = [0, 96], sizes = [8, 32], strides = [1, 1]} : vector<8x128xf32> to vector<8x32xf32>
    %90 = arith.mulf %87, %53 : vector<8x32xf32>
    %91 = arith.mulf %86, %88 : vector<8x32xf32>
    %92 = arith.addf %90, %91 : vector<8x32xf32>
    %93 = math.tanh %92 : vector<8x32xf32>
    %94 = arith.mulf %89, %93 : vector<8x32xf32>
    %95 = vector.extract_strided_slice %9 {offsets = [2, 0, 0], sizes = [1, 8, 128], strides = [1, 1, 1]} : vector<8x8x128xf32> to vector<1x8x128xf32>
    %96 = vector.shape_cast %95 : vector<1x8x128xf32> to vector<8x128xf32>
    %97 = arith.addf %96, %75 : vector<8x128xf32>
    %98 = arith.negf %97 : vector<8x128xf32>
    %99 = math.exp %98 : vector<8x128xf32>
    %cst_21 = arith.constant 1.000000e+00 : f32
    %100 = vector.broadcast %cst_21 : f32 to vector<8x128xf32>
    %101 = arith.addf %100, %99 : vector<8x128xf32>
    %102 = arith.divf %100, %101 : vector<8x128xf32>
    %103 = math.tanh %97 : vector<8x128xf32>
    %104 = vector.extract_strided_slice %102 {offsets = [0, 0], sizes = [8, 32], strides = [1, 1]} : vector<8x128xf32> to vector<8x32xf32>
    %105 = vector.extract_strided_slice %102 {offsets = [0, 32], sizes = [8, 32], strides = [1, 1]} : vector<8x128xf32> to vector<8x32xf32>
    %106 = vector.extract_strided_slice %103 {offsets = [0, 64], sizes = [8, 32], strides = [1, 1]} : vector<8x128xf32> to vector<8x32xf32>
    %107 = vector.extract_strided_slice %102 {offsets = [0, 96], sizes = [8, 32], strides = [1, 1]} : vector<8x128xf32> to vector<8x32xf32>
    %108 = arith.mulf %105, %71 : vector<8x32xf32>
    %109 = arith.mulf %104, %106 : vector<8x32xf32>
    %110 = arith.addf %108, %109 : vector<8x32xf32>
    %111 = math.tanh %110 : vector<8x32xf32>
    %112 = arith.mulf %107, %111 : vector<8x32xf32>
    %cst_22 = arith.constant dense<0.000000e+00> : vector<8x256xf32>
    %113 = tpu.matmul %112, %13, %cst_22 {dimension_numbers = #tpu.dot_dimension_numbers<[1], [0], [0], [1], [0, 0, 1, 1], [], []>} : vector<8x32xf32>, vector<32x256xf32>, vector<8x256xf32> -> vector<8x256xf32>
    %114 = vector.extract_strided_slice %113 {offsets = [0, 0], sizes = [8, 128], strides = [1, 1]} : vector<8x256xf32> to vector<8x128xf32>
    %115 = vector.extract_strided_slice %113 {offsets = [0, 128], sizes = [8, 128], strides = [1, 1]} : vector<8x256xf32> to vector<8x128xf32>
    %cst_23 = arith.constant dense<0.000000e+00> : vector<8x128xf32>
    %116 = tpu.matmul %94, %14, %cst_23 {dimension_numbers = #tpu.dot_dimension_numbers<[1], [0], [0], [1], [0, 0, 1, 1], [], []>} : vector<8x32xf32>, vector<32x128xf32>, vector<8x128xf32> -> vector<8x128xf32>
    %117 = arith.addf %115, %116 : vector<8x128xf32>
    %118 = arith.addf %117, %12 : vector<8x128xf32>
    %119 = arith.negf %118 : vector<8x128xf32>
    %120 = math.exp %119 : vector<8x128xf32>
    %cst_24 = arith.constant 1.000000e+00 : f32
    %121 = vector.broadcast %cst_24 : f32 to vector<8x128xf32>
    %122 = arith.addf %121, %120 : vector<8x128xf32>
    %123 = arith.divf %121, %122 : vector<8x128xf32>
    %124 = math.tanh %118 : vector<8x128xf32>
    %125 = vector.extract_strided_slice %123 {offsets = [0, 0], sizes = [8, 32], strides = [1, 1]} : vector<8x128xf32> to vector<8x32xf32>
    %126 = vector.extract_strided_slice %123 {offsets = [0, 32], sizes = [8, 32], strides = [1, 1]} : vector<8x128xf32> to vector<8x32xf32>
    %127 = vector.extract_strided_slice %124 {offsets = [0, 64], sizes = [8, 32], strides = [1, 1]} : vector<8x128xf32> to vector<8x32xf32>
    %128 = vector.extract_strided_slice %123 {offsets = [0, 96], sizes = [8, 32], strides = [1, 1]} : vector<8x128xf32> to vector<8x32xf32>
    %129 = arith.mulf %126, %92 : vector<8x32xf32>
    %130 = arith.mulf %125, %127 : vector<8x32xf32>
    %131 = arith.addf %129, %130 : vector<8x32xf32>
    %132 = math.tanh %131 : vector<8x32xf32>
    %133 = arith.mulf %128, %132 : vector<8x32xf32>
    %134 = vector.extract_strided_slice %9 {offsets = [3, 0, 0], sizes = [1, 8, 128], strides = [1, 1, 1]} : vector<8x8x128xf32> to vector<1x8x128xf32>
    %135 = vector.shape_cast %134 : vector<1x8x128xf32> to vector<8x128xf32>
    %136 = arith.addf %135, %114 : vector<8x128xf32>
    %137 = arith.negf %136 : vector<8x128xf32>
    %138 = math.exp %137 : vector<8x128xf32>
    %cst_25 = arith.constant 1.000000e+00 : f32
    %139 = vector.broadcast %cst_25 : f32 to vector<8x128xf32>
    %140 = arith.addf %139, %138 : vector<8x128xf32>
    %141 = arith.divf %139, %140 : vector<8x128xf32>
    %142 = math.tanh %136 : vector<8x128xf32>
    %143 = vector.extract_strided_slice %141 {offsets = [0, 0], sizes = [8, 32], strides = [1, 1]} : vector<8x128xf32> to vector<8x32xf32>
    %144 = vector.extract_strided_slice %141 {offsets = [0, 32], sizes = [8, 32], strides = [1, 1]} : vector<8x128xf32> to vector<8x32xf32>
    %145 = vector.extract_strided_slice %142 {offsets = [0, 64], sizes = [8, 32], strides = [1, 1]} : vector<8x128xf32> to vector<8x32xf32>
    %146 = vector.extract_strided_slice %141 {offsets = [0, 96], sizes = [8, 32], strides = [1, 1]} : vector<8x128xf32> to vector<8x32xf32>
    %147 = arith.mulf %144, %110 : vector<8x32xf32>
    %148 = arith.mulf %143, %145 : vector<8x32xf32>
    %149 = arith.addf %147, %148 : vector<8x32xf32>
    %150 = math.tanh %149 : vector<8x32xf32>
    %151 = arith.mulf %146, %150 : vector<8x32xf32>
    %cst_26 = arith.constant dense<0.000000e+00> : vector<8x256xf32>
    %152 = tpu.matmul %151, %13, %cst_26 {dimension_numbers = #tpu.dot_dimension_numbers<[1], [0], [0], [1], [0, 0, 1, 1], [], []>} : vector<8x32xf32>, vector<32x256xf32>, vector<8x256xf32> -> vector<8x256xf32>
    %153 = vector.extract_strided_slice %152 {offsets = [0, 0], sizes = [8, 128], strides = [1, 1]} : vector<8x256xf32> to vector<8x128xf32>
    %154 = vector.extract_strided_slice %152 {offsets = [0, 128], sizes = [8, 128], strides = [1, 1]} : vector<8x256xf32> to vector<8x128xf32>
    %cst_27 = arith.constant dense<0.000000e+00> : vector<8x128xf32>
    %155 = tpu.matmul %133, %14, %cst_27 {dimension_numbers = #tpu.dot_dimension_numbers<[1], [0], [0], [1], [0, 0, 1, 1], [], []>} : vector<8x32xf32>, vector<32x128xf32>, vector<8x128xf32> -> vector<8x128xf32>
    %156 = arith.addf %154, %155 : vector<8x128xf32>
    %157 = arith.addf %156, %12 : vector<8x128xf32>
    %158 = arith.negf %157 : vector<8x128xf32>
    %159 = math.exp %158 : vector<8x128xf32>
    %cst_28 = arith.constant 1.000000e+00 : f32
    %160 = vector.broadcast %cst_28 : f32 to vector<8x128xf32>
    %161 = arith.addf %160, %159 : vector<8x128xf32>
    %162 = arith.divf %160, %161 : vector<8x128xf32>
    %163 = math.tanh %157 : vector<8x128xf32>
    %164 = vector.extract_strided_slice %162 {offsets = [0, 0], sizes = [8, 32], strides = [1, 1]} : vector<8x128xf32> to vector<8x32xf32>
    %165 = vector.extract_strided_slice %162 {offsets = [0, 32], sizes = [8, 32], strides = [1, 1]} : vector<8x128xf32> to vector<8x32xf32>
    %166 = vector.extract_strided_slice %163 {offsets = [0, 64], sizes = [8, 32], strides = [1, 1]} : vector<8x128xf32> to vector<8x32xf32>
    %167 = vector.extract_strided_slice %162 {offsets = [0, 96], sizes = [8, 32], strides = [1, 1]} : vector<8x128xf32> to vector<8x32xf32>
    %168 = arith.mulf %165, %131 : vector<8x32xf32>
    %169 = arith.mulf %164, %166 : vector<8x32xf32>
    %170 = arith.addf %168, %169 : vector<8x32xf32>
    %171 = math.tanh %170 : vector<8x32xf32>
    %172 = arith.mulf %167, %171 : vector<8x32xf32>
    %173 = vector.extract_strided_slice %9 {offsets = [4, 0, 0], sizes = [1, 8, 128], strides = [1, 1, 1]} : vector<8x8x128xf32> to vector<1x8x128xf32>
    %174 = vector.shape_cast %173 : vector<1x8x128xf32> to vector<8x128xf32>
    %175 = arith.addf %174, %153 : vector<8x128xf32>
    %176 = arith.negf %175 : vector<8x128xf32>
    %177 = math.exp %176 : vector<8x128xf32>
    %cst_29 = arith.constant 1.000000e+00 : f32
    %178 = vector.broadcast %cst_29 : f32 to vector<8x128xf32>
    %179 = arith.addf %178, %177 : vector<8x128xf32>
    %180 = arith.divf %178, %179 : vector<8x128xf32>
    %181 = math.tanh %175 : vector<8x128xf32>
    %182 = vector.extract_strided_slice %180 {offsets = [0, 0], sizes = [8, 32], strides = [1, 1]} : vector<8x128xf32> to vector<8x32xf32>
    %183 = vector.extract_strided_slice %180 {offsets = [0, 32], sizes = [8, 32], strides = [1, 1]} : vector<8x128xf32> to vector<8x32xf32>
    %184 = vector.extract_strided_slice %181 {offsets = [0, 64], sizes = [8, 32], strides = [1, 1]} : vector<8x128xf32> to vector<8x32xf32>
    %185 = vector.extract_strided_slice %180 {offsets = [0, 96], sizes = [8, 32], strides = [1, 1]} : vector<8x128xf32> to vector<8x32xf32>
    %186 = arith.mulf %183, %149 : vector<8x32xf32>
    %187 = arith.mulf %182, %184 : vector<8x32xf32>
    %188 = arith.addf %186, %187 : vector<8x32xf32>
    %189 = math.tanh %188 : vector<8x32xf32>
    %190 = arith.mulf %185, %189 : vector<8x32xf32>
    %cst_30 = arith.constant dense<0.000000e+00> : vector<8x256xf32>
    %191 = tpu.matmul %190, %13, %cst_30 {dimension_numbers = #tpu.dot_dimension_numbers<[1], [0], [0], [1], [0, 0, 1, 1], [], []>} : vector<8x32xf32>, vector<32x256xf32>, vector<8x256xf32> -> vector<8x256xf32>
    %192 = vector.extract_strided_slice %191 {offsets = [0, 0], sizes = [8, 128], strides = [1, 1]} : vector<8x256xf32> to vector<8x128xf32>
    %193 = vector.extract_strided_slice %191 {offsets = [0, 128], sizes = [8, 128], strides = [1, 1]} : vector<8x256xf32> to vector<8x128xf32>
    %cst_31 = arith.constant dense<0.000000e+00> : vector<8x128xf32>
    %194 = tpu.matmul %172, %14, %cst_31 {dimension_numbers = #tpu.dot_dimension_numbers<[1], [0], [0], [1], [0, 0, 1, 1], [], []>} : vector<8x32xf32>, vector<32x128xf32>, vector<8x128xf32> -> vector<8x128xf32>
    %195 = arith.addf %193, %194 : vector<8x128xf32>
    %196 = arith.addf %195, %12 : vector<8x128xf32>
    %197 = arith.negf %196 : vector<8x128xf32>
    %198 = math.exp %197 : vector<8x128xf32>
    %cst_32 = arith.constant 1.000000e+00 : f32
    %199 = vector.broadcast %cst_32 : f32 to vector<8x128xf32>
    %200 = arith.addf %199, %198 : vector<8x128xf32>
    %201 = arith.divf %199, %200 : vector<8x128xf32>
    %202 = math.tanh %196 : vector<8x128xf32>
    %203 = vector.extract_strided_slice %201 {offsets = [0, 0], sizes = [8, 32], strides = [1, 1]} : vector<8x128xf32> to vector<8x32xf32>
    %204 = vector.extract_strided_slice %201 {offsets = [0, 32], sizes = [8, 32], strides = [1, 1]} : vector<8x128xf32> to vector<8x32xf32>
    %205 = vector.extract_strided_slice %202 {offsets = [0, 64], sizes = [8, 32], strides = [1, 1]} : vector<8x128xf32> to vector<8x32xf32>
    %206 = vector.extract_strided_slice %201 {offsets = [0, 96], sizes = [8, 32], strides = [1, 1]} : vector<8x128xf32> to vector<8x32xf32>
    %207 = arith.mulf %204, %170 : vector<8x32xf32>
    %208 = arith.mulf %203, %205 : vector<8x32xf32>
    %209 = arith.addf %207, %208 : vector<8x32xf32>
    %210 = math.tanh %209 : vector<8x32xf32>
    %211 = arith.mulf %206, %210 : vector<8x32xf32>
    %212 = vector.extract_strided_slice %9 {offsets = [5, 0, 0], sizes = [1, 8, 128], strides = [1, 1, 1]} : vector<8x8x128xf32> to vector<1x8x128xf32>
    %213 = vector.shape_cast %212 : vector<1x8x128xf32> to vector<8x128xf32>
    %214 = arith.addf %213, %192 : vector<8x128xf32>
    %215 = arith.negf %214 : vector<8x128xf32>
    %216 = math.exp %215 : vector<8x128xf32>
    %cst_33 = arith.constant 1.000000e+00 : f32
    %217 = vector.broadcast %cst_33 : f32 to vector<8x128xf32>
    %218 = arith.addf %217, %216 : vector<8x128xf32>
    %219 = arith.divf %217, %218 : vector<8x128xf32>
    %220 = math.tanh %214 : vector<8x128xf32>
    %221 = vector.extract_strided_slice %219 {offsets = [0, 0], sizes = [8, 32], strides = [1, 1]} : vector<8x128xf32> to vector<8x32xf32>
    %222 = vector.extract_strided_slice %219 {offsets = [0, 32], sizes = [8, 32], strides = [1, 1]} : vector<8x128xf32> to vector<8x32xf32>
    %223 = vector.extract_strided_slice %220 {offsets = [0, 64], sizes = [8, 32], strides = [1, 1]} : vector<8x128xf32> to vector<8x32xf32>
    %224 = vector.extract_strided_slice %219 {offsets = [0, 96], sizes = [8, 32], strides = [1, 1]} : vector<8x128xf32> to vector<8x32xf32>
    %225 = arith.mulf %222, %188 : vector<8x32xf32>
    %226 = arith.mulf %221, %223 : vector<8x32xf32>
    %227 = arith.addf %225, %226 : vector<8x32xf32>
    %228 = math.tanh %227 : vector<8x32xf32>
    %229 = arith.mulf %224, %228 : vector<8x32xf32>
    %cst_34 = arith.constant dense<0.000000e+00> : vector<8x256xf32>
    %230 = tpu.matmul %229, %13, %cst_34 {dimension_numbers = #tpu.dot_dimension_numbers<[1], [0], [0], [1], [0, 0, 1, 1], [], []>} : vector<8x32xf32>, vector<32x256xf32>, vector<8x256xf32> -> vector<8x256xf32>
    %231 = vector.extract_strided_slice %230 {offsets = [0, 0], sizes = [8, 128], strides = [1, 1]} : vector<8x256xf32> to vector<8x128xf32>
    %232 = vector.extract_strided_slice %230 {offsets = [0, 128], sizes = [8, 128], strides = [1, 1]} : vector<8x256xf32> to vector<8x128xf32>
    %cst_35 = arith.constant dense<0.000000e+00> : vector<8x128xf32>
    %233 = tpu.matmul %211, %14, %cst_35 {dimension_numbers = #tpu.dot_dimension_numbers<[1], [0], [0], [1], [0, 0, 1, 1], [], []>} : vector<8x32xf32>, vector<32x128xf32>, vector<8x128xf32> -> vector<8x128xf32>
    %234 = arith.addf %232, %233 : vector<8x128xf32>
    %235 = arith.addf %234, %12 : vector<8x128xf32>
    %236 = arith.negf %235 : vector<8x128xf32>
    %237 = math.exp %236 : vector<8x128xf32>
    %cst_36 = arith.constant 1.000000e+00 : f32
    %238 = vector.broadcast %cst_36 : f32 to vector<8x128xf32>
    %239 = arith.addf %238, %237 : vector<8x128xf32>
    %240 = arith.divf %238, %239 : vector<8x128xf32>
    %241 = math.tanh %235 : vector<8x128xf32>
    %242 = vector.extract_strided_slice %240 {offsets = [0, 0], sizes = [8, 32], strides = [1, 1]} : vector<8x128xf32> to vector<8x32xf32>
    %243 = vector.extract_strided_slice %240 {offsets = [0, 32], sizes = [8, 32], strides = [1, 1]} : vector<8x128xf32> to vector<8x32xf32>
    %244 = vector.extract_strided_slice %241 {offsets = [0, 64], sizes = [8, 32], strides = [1, 1]} : vector<8x128xf32> to vector<8x32xf32>
    %245 = vector.extract_strided_slice %240 {offsets = [0, 96], sizes = [8, 32], strides = [1, 1]} : vector<8x128xf32> to vector<8x32xf32>
    %246 = arith.mulf %243, %209 : vector<8x32xf32>
    %247 = arith.mulf %242, %244 : vector<8x32xf32>
    %248 = arith.addf %246, %247 : vector<8x32xf32>
    %249 = math.tanh %248 : vector<8x32xf32>
    %250 = arith.mulf %245, %249 : vector<8x32xf32>
    %251 = vector.extract_strided_slice %9 {offsets = [6, 0, 0], sizes = [1, 8, 128], strides = [1, 1, 1]} : vector<8x8x128xf32> to vector<1x8x128xf32>
    %252 = vector.shape_cast %251 : vector<1x8x128xf32> to vector<8x128xf32>
    %253 = arith.addf %252, %231 : vector<8x128xf32>
    %254 = arith.negf %253 : vector<8x128xf32>
    %255 = math.exp %254 : vector<8x128xf32>
    %cst_37 = arith.constant 1.000000e+00 : f32
    %256 = vector.broadcast %cst_37 : f32 to vector<8x128xf32>
    %257 = arith.addf %256, %255 : vector<8x128xf32>
    %258 = arith.divf %256, %257 : vector<8x128xf32>
    %259 = math.tanh %253 : vector<8x128xf32>
    %260 = vector.extract_strided_slice %258 {offsets = [0, 0], sizes = [8, 32], strides = [1, 1]} : vector<8x128xf32> to vector<8x32xf32>
    %261 = vector.extract_strided_slice %258 {offsets = [0, 32], sizes = [8, 32], strides = [1, 1]} : vector<8x128xf32> to vector<8x32xf32>
    %262 = vector.extract_strided_slice %259 {offsets = [0, 64], sizes = [8, 32], strides = [1, 1]} : vector<8x128xf32> to vector<8x32xf32>
    %263 = vector.extract_strided_slice %258 {offsets = [0, 96], sizes = [8, 32], strides = [1, 1]} : vector<8x128xf32> to vector<8x32xf32>
    %264 = arith.mulf %261, %227 : vector<8x32xf32>
    %265 = arith.mulf %260, %262 : vector<8x32xf32>
    %266 = arith.addf %264, %265 : vector<8x32xf32>
    %267 = math.tanh %266 : vector<8x32xf32>
    %268 = arith.mulf %263, %267 : vector<8x32xf32>
    %cst_38 = arith.constant dense<0.000000e+00> : vector<8x256xf32>
    %269 = tpu.matmul %268, %13, %cst_38 {dimension_numbers = #tpu.dot_dimension_numbers<[1], [0], [0], [1], [0, 0, 1, 1], [], []>} : vector<8x32xf32>, vector<32x256xf32>, vector<8x256xf32> -> vector<8x256xf32>
    %270 = vector.extract_strided_slice %269 {offsets = [0, 0], sizes = [8, 128], strides = [1, 1]} : vector<8x256xf32> to vector<8x128xf32>
    %271 = vector.extract_strided_slice %269 {offsets = [0, 128], sizes = [8, 128], strides = [1, 1]} : vector<8x256xf32> to vector<8x128xf32>
    %cst_39 = arith.constant dense<0.000000e+00> : vector<8x128xf32>
    %272 = tpu.matmul %250, %14, %cst_39 {dimension_numbers = #tpu.dot_dimension_numbers<[1], [0], [0], [1], [0, 0, 1, 1], [], []>} : vector<8x32xf32>, vector<32x128xf32>, vector<8x128xf32> -> vector<8x128xf32>
    %273 = arith.addf %271, %272 : vector<8x128xf32>
    %274 = arith.addf %273, %12 : vector<8x128xf32>
    %275 = arith.negf %274 : vector<8x128xf32>
    %276 = math.exp %275 : vector<8x128xf32>
    %cst_40 = arith.constant 1.000000e+00 : f32
    %277 = vector.broadcast %cst_40 : f32 to vector<8x128xf32>
    %278 = arith.addf %277, %276 : vector<8x128xf32>
    %279 = arith.divf %277, %278 : vector<8x128xf32>
    %280 = math.tanh %274 : vector<8x128xf32>
    %281 = vector.extract_strided_slice %279 {offsets = [0, 0], sizes = [8, 32], strides = [1, 1]} : vector<8x128xf32> to vector<8x32xf32>
    %282 = vector.extract_strided_slice %279 {offsets = [0, 32], sizes = [8, 32], strides = [1, 1]} : vector<8x128xf32> to vector<8x32xf32>
    %283 = vector.extract_strided_slice %280 {offsets = [0, 64], sizes = [8, 32], strides = [1, 1]} : vector<8x128xf32> to vector<8x32xf32>
    %284 = vector.extract_strided_slice %279 {offsets = [0, 96], sizes = [8, 32], strides = [1, 1]} : vector<8x128xf32> to vector<8x32xf32>
    %285 = arith.mulf %282, %248 : vector<8x32xf32>
    %286 = arith.mulf %281, %283 : vector<8x32xf32>
    %287 = arith.addf %285, %286 : vector<8x32xf32>
    %288 = math.tanh %287 : vector<8x32xf32>
    %289 = arith.mulf %284, %288 : vector<8x32xf32>
    %290 = vector.extract_strided_slice %9 {offsets = [7, 0, 0], sizes = [1, 8, 128], strides = [1, 1, 1]} : vector<8x8x128xf32> to vector<1x8x128xf32>
    %291 = vector.shape_cast %290 : vector<1x8x128xf32> to vector<8x128xf32>
    %292 = arith.addf %291, %270 : vector<8x128xf32>
    %293 = arith.negf %292 : vector<8x128xf32>
    %294 = math.exp %293 : vector<8x128xf32>
    %cst_41 = arith.constant 1.000000e+00 : f32
    %295 = vector.broadcast %cst_41 : f32 to vector<8x128xf32>
    %296 = arith.addf %295, %294 : vector<8x128xf32>
    %297 = arith.divf %295, %296 : vector<8x128xf32>
    %298 = math.tanh %292 : vector<8x128xf32>
    %299 = vector.extract_strided_slice %297 {offsets = [0, 0], sizes = [8, 32], strides = [1, 1]} : vector<8x128xf32> to vector<8x32xf32>
    %300 = vector.extract_strided_slice %297 {offsets = [0, 32], sizes = [8, 32], strides = [1, 1]} : vector<8x128xf32> to vector<8x32xf32>
    %301 = vector.extract_strided_slice %298 {offsets = [0, 64], sizes = [8, 32], strides = [1, 1]} : vector<8x128xf32> to vector<8x32xf32>
    %302 = vector.extract_strided_slice %297 {offsets = [0, 96], sizes = [8, 32], strides = [1, 1]} : vector<8x128xf32> to vector<8x32xf32>
    %303 = arith.mulf %300, %266 : vector<8x32xf32>
    %304 = arith.mulf %299, %301 : vector<8x32xf32>
    %305 = arith.addf %303, %304 : vector<8x32xf32>
    %306 = math.tanh %305 : vector<8x32xf32>
    %307 = arith.mulf %302, %306 : vector<8x32xf32>
    %cst_42 = arith.constant dense<0.000000e+00> : vector<8x256xf32>
    %308 = tpu.matmul %307, %13, %cst_42 {dimension_numbers = #tpu.dot_dimension_numbers<[1], [0], [0], [1], [0, 0, 1, 1], [], []>} : vector<8x32xf32>, vector<32x256xf32>, vector<8x256xf32> -> vector<8x256xf32>
    %309 = vector.extract_strided_slice %308 {offsets = [0, 128], sizes = [8, 128], strides = [1, 1]} : vector<8x256xf32> to vector<8x128xf32>
    %cst_43 = arith.constant dense<0.000000e+00> : vector<8x128xf32>
    %310 = tpu.matmul %289, %14, %cst_43 {dimension_numbers = #tpu.dot_dimension_numbers<[1], [0], [0], [1], [0, 0, 1, 1], [], []>} : vector<8x32xf32>, vector<32x128xf32>, vector<8x128xf32> -> vector<8x128xf32>
    %311 = arith.addf %309, %310 : vector<8x128xf32>
    %312 = arith.addf %311, %12 : vector<8x128xf32>
    %313 = arith.negf %312 : vector<8x128xf32>
    %314 = math.exp %313 : vector<8x128xf32>
    %cst_44 = arith.constant 1.000000e+00 : f32
    %315 = vector.broadcast %cst_44 : f32 to vector<8x128xf32>
    %316 = arith.addf %315, %314 : vector<8x128xf32>
    %317 = arith.divf %315, %316 : vector<8x128xf32>
    %318 = math.tanh %312 : vector<8x128xf32>
    %319 = vector.extract_strided_slice %317 {offsets = [0, 0], sizes = [8, 32], strides = [1, 1]} : vector<8x128xf32> to vector<8x32xf32>
    %320 = vector.extract_strided_slice %317 {offsets = [0, 32], sizes = [8, 32], strides = [1, 1]} : vector<8x128xf32> to vector<8x32xf32>
    %321 = vector.extract_strided_slice %318 {offsets = [0, 64], sizes = [8, 32], strides = [1, 1]} : vector<8x128xf32> to vector<8x32xf32>
    %322 = vector.extract_strided_slice %317 {offsets = [0, 96], sizes = [8, 32], strides = [1, 1]} : vector<8x128xf32> to vector<8x32xf32>
    %323 = arith.mulf %320, %287 : vector<8x32xf32>
    %324 = arith.mulf %319, %321 : vector<8x32xf32>
    %325 = arith.addf %323, %324 : vector<8x32xf32>
    %326 = math.tanh %325 : vector<8x32xf32>
    %327 = arith.mulf %322, %326 : vector<8x32xf32>
    %c0_45 = arith.constant 0 : index
    %c0_46 = arith.constant 0 : index
    %328 = vector.load %arg6[%c0_45, %c0_46] : memref<32x1xf32, #tpu.memory_space<vmem>>, vector<32x1xf32>
    %cst_47 = arith.constant dense<0.000000e+00> : vector<8x1xf32>
    %329 = tpu.matmul %327, %328, %cst_47 {dimension_numbers = #tpu.dot_dimension_numbers<[1], [0], [0], [1], [0, 0, 1, 1], [], []>} : vector<8x32xf32>, vector<32x1xf32>, vector<8x1xf32> -> vector<8x1xf32>
    %c0_48 = arith.constant 0 : index
    %c0_49 = arith.constant 0 : index
    %330 = vector.load %arg7[%c0_48, %c0_49] : memref<1x1xf32, #tpu.memory_space<vmem>>, vector<1x1xf32>
    %331 = vector.broadcast %330 : vector<1x1xf32> to vector<8x1xf32>
    %332 = arith.addf %329, %331 : vector<8x1xf32>
    %c0_50 = arith.constant 0 : index
    %c0_51 = arith.constant 0 : index
    %333 = vector.load %arg8[%c0_50, %c0_51] : memref<8x1xf32, #tpu.memory_space<vmem>>, vector<8x1xf32>
    tpu.vector_store %arg8[%c0_50, %c0_51], %332 {strides = array<i32>} : memref<8x1xf32, #tpu.memory_space<vmem>>, vector<8x1xf32>,
    return
  }
}

</mosaic_0001>

<bundles_post_ra>
// kernel: lstm_forward.1
= control target key start
LH: loop header
LB: loop body
LE: loop exit
PB: predicated region body
PF: predicated region fallthrough
CT: control target
= control target key end

     0   :  { %v1493_v0 = vmov 0   ;;  %s1494_s11 = smov 64   ;;  %s1495_s12 = smov 32   ;;  %v1496_v39 = vmov 0.0   ;;  %vm160_vm4 = vcmask 261120   ;;  %s1934_s0 = inlined_call_operand.vmem [shape: f32[8,8,1], index: 0, kind: input, shape index: {}]   ;;  %s1935_s1 = inlined_call_operand.vmem [shape: f32[1,128], index: 1, kind: input, shape index: {}]   ;;  %s1936_s2 = inlined_call_operand.vmem [shape: f32[1,128], index: 2, kind: input, shape index: {}]   ;;  %s1937_s4 = inlined_call_operand.vmem [shape: f32[32,128], index: 4, kind: input, shape index: {}]   ;;  %s1938_s3 = inlined_call_operand.vmem [shape: f32[32,256], index: 3, kind: input, shape index: {}]   ;;  %s1939_s5 = inlined_call_operand.vmem [shape: f32[1,128], index: 5, kind: input, shape index: {}]   ;;  %s1940_s6 = inlined_call_operand.vmem [shape: f32[32,1], index: 6, kind: input, shape index: {}]   ;;  %s1941_s7 = inlined_call_operand.<no memory space> [shape: f32[1,1], index: 7, kind: input, shape index: {}]   ;;  %s1942_s8 = inlined_call_operand.vmem [shape: f32[8,1], index: 8, kind: output, shape index: {}]  }
   0x1   :  { %1356 = vset.pattern.permute.xlu0 %v1493_v0  ;;  %v31_v1 = vld [vmem:[%s1934_s0] sm:$0xff]  ;;  %1357 = vset.pattern.permute.xlu2 %v1493_v0  ;;  %v1570_v27 = vld [vmem:[%s1937_s4 + $0x18] sm:$0xff]  ;;  %v1575_v28 = vld [vmem:[%s1937_s4 + $0x10] sm:$0xff] }
   0x2   :  { %42 = vperm.xlu0 %1356, %v31_v1   ;;  %v1548_v2 = vld [vmem:[%s1935_s1] ss:$0 sm:$0xff]  ;;  %218 = vmatpush.msra.mxu2 %v1570_v27  ;;  %v1581_v29 = vld [vmem:[%s1938_s3 + $0x30] sm:$0xff]  ;;  %v1586_v30 = vld [vmem:[%s1938_s3 + $0x38] sm:$0xff] }
   0x3   :  { %v1553_v3 = vld [vmem:[%s1936_s2] ss:$0 sm:$0xff]  ;;  %v1591_v31 = vld [vmem:[%s1937_s4 + $0x8] sm:$0xff]  ;;  %175 = vmatpush.msra.mxu0 %v1581_v29  ;;  %195 = vmatpush.msra.mxu1 %v1586_v30  ;;  %v1609_v34 = vld [vmem:[%s1938_s3 + $0x10] sm:$0xff] }
   0x4   :  { %v1598_v32 = vld [vmem:[%s1938_s3 + $0x20] sm:$0xff]  ;;  %v1603_v33 = vld [vmem:[%s1938_s3 + $0x28] sm:$0xff]  ;;  %219 = vmatpush.msra.mxu2 %v1575_v28  ;;  %v1614_v35 = vld [vmem:[%s1938_s3 + $0x18] sm:$0xff]  ;;  %320 = vmatpush.msra.mxu3 %v1581_v29 }
   0x5   :  { %v1620_v36 = vld [vmem:[%s1937_s4] sm:$0xff]  ;;  %176 = vmatpush.msra.mxu0 %v1598_v32  ;;  %196 = vmatpush.msra.mxu1 %v1603_v33  ;;  %v1636_v38 = vld [vmem:[%s1938_s3 + $0x8] sm:$0xff] }
   0x6   :  { %220 = vmatpush.msra.mxu2 %v1591_v31  ;;  %v1628_v37 = vld [vmem:[%s1938_s3] sm:$0xff]  ;;  %321 = vmatpush.msra.mxu3 %v1598_v32  ;;  %v32_v42 = vld [vmem:[%s1934_s0 + $0x8] sm:$0xff] }
   0x7   :  { %177 = vmatpush.msra.mxu0 %v1609_v34  ;;  %197 = vmatpush.msra.mxu1 %v1614_v35  ;;  %v1683_v48 = vld [vmem:[%s1939_s5] ss:$0 sm:$0xff] }
   0x8   :  { %221 = vmatpush.msra.mxu2 %v1620_v36  ;;  %322 = vmatpush.msra.mxu3 %v1609_v34 }
   0x9   :  { %222 = vmatmul.f32.vlgmr.msra.gmra.mxu2 %v1496_v39  ;;  %178 = vmatpush.msra.mxu0 %v1628_v37 }
   0xa   :  { %198 = vmatpush.msra.mxu1 %v1636_v38  ;;  %323 = vmatpush.msra.mxu3 %v1628_v37 }
   0xb   :  { %340 = vmatpush.msrb.mxu0 %v1586_v30  ;;  %467 = vmatpush.msrb.mxu2 %v1581_v29 }
   0xc   :  { %365 = vmatpush.msrb.mxu1 %v1570_v27  ;;  %487 = vmatpush.msrb.mxu3 %v1586_v30 }
   0xd   :  { %341 = vmatpush.msrb.mxu0 %v1603_v33  ;;  %468 = vmatpush.msrb.mxu2 %v1598_v32 }
   0xe   :  { %366 = vmatpush.msrb.mxu1 %v1575_v28  ;;  %488 = vmatpush.msrb.mxu3 %v1603_v33 }
   0xf   :  { %342 = vmatpush.msrb.mxu0 %v1614_v35  ;;  %469 = vmatpush.msrb.mxu2 %v1609_v34 }
  0x10   :  { %367 = vmatpush.msrb.mxu1 %v1591_v31  ;;  %489 = vmatpush.msrb.mxu3 %v1614_v35 }
  0x11   :  { %343 = vmatpush.msrb.mxu0 %v1636_v38  ;;  %470 = vmatpush.msrb.mxu2 %v1628_v37 }
  0x12   :  { %368 = vmatpush.msrb.mxu1 %v1620_v36  ;;  %490 = vmatpush.msrb.mxu3 %v1636_v38 }
  0x13   :  { %634 = vmatpush.msra.mxu2 %v1586_v30 }
  0x15   :  { %635 = vmatpush.msra.mxu2 %v1603_v33 }
  0x17   :  { %636 = vmatpush.msra.mxu2 %v1614_v35 }
  0x19   :  { %637 = vmatpush.msra.mxu2 %v1636_v38 }
  0x74   :  { %v43_v4 = vpop.permute.xlu0 %42 }
  0x75   :  { %v83_v5 = vmul.f32 %v1548_v2, %v43_v4 }
  0x77   :  { %v95_v6 = vadd.f32 %v1553_v3, %v83_v5 }
  0x79   :  { %1362 = vtanh.f32 %v95_v6  ;;  %v1313_v8 = vmul.f32 -1.442695, %v95_v6 }
  0x7b   :  { %1364 = vpow2.f32 %v1313_v8 }
  0x7f   :  { %v1363_v7 = vpop.eup %1362 }
  0x80   :  { %142 = vrot.lane.b32.xlu0 %v1363_v7, %s1494_s11 }
  0x81   :  { %v1365_v9 = vpop.eup %1364 }
  0x82   :  { %v123_v10 = vadd.f32 1.0, %v1365_v9 }
  0x84   :  { %1366 = vrcp.f32 %v123_v10  ;;  %v135_v16 = vand.u32 2147483648, %v123_v10  ;;  %vm129_vm1 = vweird.f32 %v123_v10  ;;  %v133_v17 = vand.u32 2147483647, %v123_v10 }
  0x86   :  { %v136_v19 = vor.u32 1.1754944e-38, %v135_v16  ;;  %vm134_vm3 = vcmp.eq.f32.partialorder %v133_v17, 8.507059e+37 }
  0x8a   :  { %v1367_v11 = vpop.eup %1366 }
  0x8b   :  { %v125_v12 = vmul.f32 %v1367_v11, %v123_v10  ;;  %vm130_vm0 = vweird.f32 %v1367_v11 }
  0x8c   :  { %vm131_vm2 = vmor %vm129_vm1, %vm130_vm0  ;;  %v223_v47 = vpop.f32.mrf.mxu2 }
  0x8d   :  { %v126_v13 = vsub.f32 1.0, %v125_v12 }
  0x8f   :  { %v127_v14 = vmul.f32 %v1367_v11, %v126_v13 }
  0x91   :  { %v128_v15 = vadd.f32 %v1367_v11, %v127_v14 }
  0x93   :  { %v132_v18 = vsel %vm131_vm2, %v1367_v11, %v128_v15 }
  0x94   :  { %v1558_v21 = vsel %vm134_vm3, %v136_v19, %v132_v18 }
  0x95   :  { %v140_v23 = vmul.f32 0.0, %v1558_v21 }
  0xf2   :  { %v143_v20 = vpop.permute.xlu0 %142 }
  0xf3   :  { %v145_v22 = vmul.f32 %v143_v20, %v1558_v21 }
  0xf5   :  { %147 = vrot.lane.b32.xlu1 %v145_v22, %s1495_s12 }
 0x167   :  { %v148_v24 = vpop.permute.xlu1 %147 }
 0x168   :  { %v1563_v25 = vadd.f32 %v148_v24, %v140_v23 }
 0x16a   :  { %1368 = vtanh.f32 %v1563_v25 }
 0x170   :  { %v1369_v26 = vpop.eup %1368 }
 0x171   :  { %153 = vrot.lane.b32.xlu1 %v1369_v26, %s1494_s11 }
 0x1e3   :  { %v154_v40 = vpop.permute.xlu1 %153 }
 0x1e4   :  { %v156_v41 = vmul.f32 %v154_v40, %v1558_v21 }
 0x1e6   :  { %158 = vrot.lane.b32.xlu2 %v156_v41, %s1495_s12 }
 0x1ee   :  { %47 = vperm.xlu2 %1357, %v32_v42  }
 0x240   :  { %v159_v43 = vpop.permute.xlu2 %158 }
 0x241   :  { %1314 = vmatmul.msk.f32.vlgmr.msra.gmra.mxu0 %vm160_vm4, %v159_v43  ;;  %1315 = vmatmul.msk.f32.vlgmr.msra.gmra.mxu1 %vm160_vm4, %v159_v43 }
 0x242   :  { %512 = vmatpush.msra.mxu0 %v1570_v27  ;;  %614 = vmatpush.msra.mxu1 %v1581_v29 }
 0x244   :  { %513 = vmatpush.msra.mxu0 %v1575_v28  ;;  %615 = vmatpush.msra.mxu1 %v1598_v32 }
 0x246   :  { %514 = vmatpush.msra.mxu0 %v1591_v31  ;;  %616 = vmatpush.msra.mxu1 %v1609_v34 }
 0x248   :  { %515 = vmatpush.msra.mxu0 %v1620_v36  ;;  %617 = vmatpush.msra.mxu1 %v1628_v37  ;;  %v48_v44 = vpop.permute.xlu2 %47 }
 0x249   :  { %v84_v45 = vmul.f32 %v1548_v2, %v48_v44 }
 0x24b   :  { %v96_v46 = vadd.f32 %v1553_v3, %v84_v45 }
 0x2be   :  { %v180_v49 = vpop.f32.mrf.mxu0  ;;  %v200_v50 = vpop.f32.mrf.mxu1 }
 0x2bf   :  { %v265_v51 = vadd.f32 %v180_v49, %v96_v46  ;;  %v226_v52 = vadd.f32 %v223_v47, %v200_v50 }
 0x2c1   :  { %1370 = vtanh.f32 %v265_v51  ;;  %v227_v53 = vadd.f32 %v1683_v48, %v226_v52  ;;  %v1317_v56 = vmul.f32 -1.442695, %v265_v51 }
 0x2c3   :  { %1372 = vtanh.f32 %v227_v53  ;;  %v1316_v57 = vmul.f32 -1.442695, %v227_v53 }
 0x2c4   :  { %1374 = vpow2.f32 %v1317_v56 }
 0x2c5   :  { %1376 = vpow2.f32 %v1316_v57 }
 0x2c7   :  { %v1371_v54 = vpop.eup %1370 }
 0x2c8   :  { %288 = vrot.lane.b32.xlu0 %v1371_v54, %s1494_s11 }
 0x2c9   :  { %v1373_v55 = vpop.eup %1372 }
 0x2ca   :  { %250 = vrot.lane.b32.xlu1 %v1373_v55, %s1494_s11  ;;  %v1375_v58 = vpop.eup %1374 }
 0x2cb   :  { %v1377_v59 = vpop.eup %1376  ;;  %v269_v60 = vadd.f32 1.0, %v1375_v58 }
 0x2cc   :  { %v231_v61 = vadd.f32 1.0, %v1377_v59 }
 0x2cd   :  { %1378 = vrcp.f32 %v269_v60  ;;  %v281_v9 = vand.u32 2147483648, %v269_v60  ;;  %vm275_vm6 = vweird.f32 %v269_v60  ;;  %v279_v10 = vand.u32 2147483647, %v269_v60 }
 0x2ce   :  { %1380 = vrcp.f32 %v231_v61  ;;  %v243_v13 = vand.u32 2147483648, %v231_v61  ;;  %vm237_vm9 = vweird.f32 %v231_v61  ;;  %v241_v15 = vand.u32 2147483647, %v231_v61 }
 0x2cf   :  { %v282_v14 = vor.u32 1.1754944e-38, %v281_v9  ;;  %vm280_vm10 = vcmp.eq.f32.partialorder %v279_v10, 8.507059e+37 }
 0x2d0   :  { %v244_v20 = vor.u32 1.1754944e-38, %v243_v13  ;;  %vm242_vm12 = vcmp.eq.f32.partialorder %v241_v15, 8.507059e+37 }
 0x2d3   :  { %v1379_v62 = vpop.eup %1378 }
 0x2d4   :  { %v1381_v63 = vpop.eup %1380  ;;  %v271_v0 = vmul.f32 %v1379_v62, %v269_v60  ;;  %vm276_vm5 = vweird.f32 %v1379_v62 }
 0x2d5   :  { %v233_v1 = vmul.f32 %v1381_v63, %v231_v61  ;;  %vm277_vm7 = vmor %vm275_vm6, %vm276_vm5  ;;  %vm238_vm8 = vweird.f32 %v1381_v63 }
 0x2d6   :  { %v272_v4 = vsub.f32 1.0, %v271_v0  ;;  %vm239_vm11 = vmor %vm237_vm9, %vm238_vm8 }
 0x2d7   :  { %v234_v5 = vsub.f32 1.0, %v233_v1 }
 0x2d8   :  { %v273_v6 = vmul.f32 %v1379_v62, %v272_v4 }
 0x2d9   :  { %v235_v7 = vmul.f32 %v1381_v63, %v234_v5 }
 0x2da   :  { %v274_v8 = vadd.f32 %v1379_v62, %v273_v6 }
 0x2db   :  { %v236_v11 = vadd.f32 %v1381_v63, %v235_v7 }
 0x2dc   :  { %v278_v12 = vsel %vm277_vm7, %v1379_v62, %v274_v8 }
 0x2dd   :  { %v283_v17 = vsel %vm280_vm10, %v282_v14, %v278_v12  ;;  %v240_v18 = vsel %vm239_vm11, %v1381_v63, %v236_v11 }
 0x2de   :  { %v245_v22 = vsel %vm242_vm12, %v244_v20, %v240_v18  ;;  %v286_v24 = vmul.f32 %v283_v17, %v1563_v25  ;;  %v33_v25 = vld [vmem:[%s1934_s0 + $0x10] sm:$0xff] }
 0x2df   :  { %v248_v41 = vmul.f32 0.0, %v245_v22 }
 0x33a   :  { %v289_v16 = vpop.permute.xlu0 %288 }
 0x33b   :  { %v291_v19 = vmul.f32 %v289_v16, %v283_v17 }
 0x33c   :  { %v251_v21 = vpop.permute.xlu1 %250 }
 0x33d   :  { %293 = vrot.lane.b32.xlu2 %v291_v19, %s1495_s12  ;;  %v253_v23 = vmul.f32 %v251_v21, %v245_v22 }
 0x33f   :  { %255 = vrot.lane.b32.xlu0 %v253_v23, %s1495_s12 }
 0x397   :  { %v294_v26 = vpop.permute.xlu2 %293 }
 0x398   :  { %v1691_v39 = vadd.f32 %v294_v26, %v286_v24 }
 0x39a   :  { %1382 = vtanh.f32 %v1691_v39 }
 0x3a0   :  { %v1383_v40 = vpop.eup %1382 }
 0x3a1   :  { %299 = vrot.lane.b32.xlu1 %v1383_v40, %s1494_s11 }
 0x3b1   :  { %v256_v42 = vpop.permute.xlu0 %255 }
 0x3b2   :  { %v1695_v43 = vadd.f32 %v256_v42, %v248_v41 }
 0x3b4   :  { %1384 = vtanh.f32 %v1695_v43 }
 0x3ba   :  { %v1385_v44 = vpop.eup %1384 }
 0x3bb   :  { %261 = vrot.lane.b32.xlu2 %v1385_v44, %s1494_s11 }
 0x3c3   :  { %52 = vperm.xlu2 %1357, %v33_v25  }
 0x413   :  { %v300_v45 = vpop.permute.xlu1 %299 }
 0x414   :  { %v302_v46 = vmul.f32 %v300_v45, %v283_v17 }
 0x415   :  { %v262_v47 = vpop.permute.xlu2 %261 }
 0x416   :  { %304 = vrot.lane.b32.xlu0 %v302_v46, %s1495_s12  ;;  %v264_v49 = vmul.f32 %v262_v47, %v245_v22 }
 0x418   :  { %349 = vrot.lane.b32.xlu1 %v264_v49, %s1495_s12 }
 0x41d   :  { %v53_v52 = vpop.permute.xlu2 %52 }
 0x41e   :  { %v85_v53 = vmul.f32 %v1548_v2, %v53_v52 }
 0x420   :  { %v97_v57 = vadd.f32 %v1553_v3, %v85_v53 }
 0x488   :  { %v305_v50 = vpop.permute.xlu0 %304 }
 0x489   :  { %1318 = vmatmul.msk.f32.vlgmr.msra.gmra.mxu3 %vm160_vm4, %v305_v50  ;;  %1319 = vmatmul.msk.f32.vlgmr.msrb.gmra.mxu0 %vm160_vm4, %v305_v50 }
 0x48a   :  { %659 = vmatpush.msra.mxu3 %v1570_v27  ;;  %761 = vmatpush.msrb.mxu0 %v1581_v29  ;;  %v350_v51 = vpop.permute.xlu1 %349 }
 0x48b   :  { %1320 = vmatmul.msk.f32.vlgmr.msrb.gmra.mxu1 %vm160_vm4, %v350_v51 }
 0x48c   :  { %660 = vmatpush.msra.mxu3 %v1575_v28  ;;  %781 = vmatpush.msrb.mxu1 %v1586_v30 }
 0x48d   :  { %762 = vmatpush.msrb.mxu0 %v1598_v32 }
 0x48e   :  { %661 = vmatpush.msra.mxu3 %v1591_v31  ;;  %782 = vmatpush.msrb.mxu1 %v1603_v33 }
 0x48f   :  { %763 = vmatpush.msrb.mxu0 %v1609_v34 }
 0x490   :  { %662 = vmatpush.msra.mxu3 %v1620_v36  ;;  %783 = vmatpush.msrb.mxu1 %v1614_v35 }
 0x491   :  { %764 = vmatpush.msrb.mxu0 %v1628_v37 }
 0x492   :  { %784 = vmatpush.msrb.mxu1 %v1636_v38 }
 0x506   :  { %v345_v54 = vpop.f32.mrf.mxu0 }
 0x508   :  { %v370_v55 = vpop.f32.mrf.mxu1 }
 0x509   :  { %v373_v56 = vadd.f32 %v370_v55, %v345_v54 }
 0x50b   :  { %v374_v58 = vadd.f32 %v1683_v48, %v373_v56 }
 0x50c   :  { %v325_v59 = vpop.f32.mrf.mxu3 }
 0x50d   :  { %v412_v60 = vadd.f32 %v325_v59, %v97_v57  ;;  %1386 = vtanh.f32 %v374_v58  ;;  %v1321_v63 = vmul.f32 -1.442695, %v374_v58 }
 0x50f   :  { %1388 = vtanh.f32 %v412_v60  ;;  %v1322_v0 = vmul.f32 -1.442695, %v412_v60 }
 0x510   :  { %1390 = vpow2.f32 %v1321_v63 }
 0x511   :  { %1392 = vpow2.f32 %v1322_v0 }
 0x513   :  { %v1387_v61 = vpop.eup %1386 }
 0x514   :  { %397 = vrot.lane.b32.xlu1 %v1387_v61, %s1494_s11 }
 0x515   :  { %v1389_v62 = vpop.eup %1388 }
 0x516   :  { %435 = vrot.lane.b32.xlu0 %v1389_v62, %s1494_s11  ;;  %v1391_v1 = vpop.eup %1390 }
 0x517   :  { %v1393_v4 = vpop.eup %1392  ;;  %v378_v5 = vadd.f32 1.0, %v1391_v1 }
 0x518   :  { %v416_v6 = vadd.f32 1.0, %v1393_v4 }
 0x519   :  { %1394 = vrcp.f32 %v378_v5  ;;  %v390_v16 = vand.u32 2147483648, %v378_v5  ;;  %vm384_vm15 = vweird.f32 %v378_v5  ;;  %v388_v18 = vand.u32 2147483647, %v378_v5 }
 0x51a   :  { %1396 = vrcp.f32 %v416_v6  ;;  %v428_v19 = vand.u32 2147483648, %v416_v6  ;;  %vm422_vm1 = vweird.f32 %v416_v6  ;;  %v426_v20 = vand.u32 2147483647, %v416_v6 }
 0x51b   :  { %v391_v22 = vor.u32 1.1754944e-38, %v390_v16  ;;  %vm389_vm3 = vcmp.eq.f32.partialorder %v388_v18, 8.507059e+37 }
 0x51c   :  { %v429_v24 = vor.u32 1.1754944e-38, %v428_v19  ;;  %vm427_vm5 = vcmp.eq.f32.partialorder %v426_v20, 8.507059e+37 }
 0x51f   :  { %v1395_v7 = vpop.eup %1394 }
 0x520   :  { %v1397_v8 = vpop.eup %1396  ;;  %v380_v9 = vmul.f32 %v1395_v7, %v378_v5  ;;  %vm385_vm13 = vweird.f32 %v1395_v7 }
 0x521   :  { %v418_v10 = vmul.f32 %v1397_v8, %v416_v6  ;;  %vm423_vm14 = vweird.f32 %v1397_v8  ;;  %vm386_vm0 = vmor %vm384_vm15, %vm385_vm13 }
 0x522   :  { %v381_v11 = vsub.f32 1.0, %v380_v9  ;;  %vm424_vm2 = vmor %vm422_vm1, %vm423_vm14 }
 0x523   :  { %v419_v12 = vsub.f32 1.0, %v418_v10 }
 0x524   :  { %v382_v13 = vmul.f32 %v1395_v7, %v381_v11 }
 0x525   :  { %v420_v14 = vmul.f32 %v1397_v8, %v419_v12 }
 0x526   :  { %v383_v15 = vadd.f32 %v1395_v7, %v382_v13 }
 0x527   :  { %v421_v17 = vadd.f32 %v1397_v8, %v420_v14 }
 0x528   :  { %v387_v21 = vsel %vm386_vm0, %v1395_v7, %v383_v15 }
 0x529   :  { %v425_v23 = vsel %vm424_vm2, %v1397_v8, %v421_v17  ;;  %v392_v40 = vsel %vm389_vm3, %v391_v22, %v387_v21 }
 0x52a   :  { %v430_v44 = vsel %vm427_vm5, %v429_v24, %v425_v23  ;;  %v395_v50 = vmul.f32 %v392_v40, %v1695_v43 }
 0x52b   :  { %v433_v45 = vmul.f32 %v430_v44, %v1691_v39  ;;  %v34_v39 = vld [vmem:[%s1934_s0 + $0x18] sm:$0xff] }
 0x586   :  { %v398_v26 = vpop.permute.xlu1 %397 }
 0x587   :  { %v400_v41 = vmul.f32 %v398_v26, %v392_v40 }
 0x588   :  { %v436_v42 = vpop.permute.xlu0 %435 }
 0x589   :  { %v438_v25 = vmul.f32 %v436_v42, %v430_v44  ;;  %402 = vrot.lane.b32.xlu0 %v400_v41, %s1495_s12 }
 0x58b   :  { %440 = vrot.lane.b32.xlu2 %v438_v25, %s1495_s12 }
 0x5e5   :  { %v441_v46 = vpop.permute.xlu2 %440 }
 0x5e6   :  { %v1727_v47 = vadd.f32 %v441_v46, %v433_v45 }
 0x5e8   :  { %1398 = vtanh.f32 %v1727_v47 }
 0x5ee   :  { %v1399_v49 = vpop.eup %1398 }
 0x5ef   :  { %446 = vrot.lane.b32.xlu1 %v1399_v49, %s1494_s11 }
 0x5fb   :  { %v403_v51 = vpop.permute.xlu0 %402 }
 0x5fc   :  { %v1732_v52 = vadd.f32 %v403_v51, %v395_v50 }
 0x5fe   :  { %1400 = vtanh.f32 %v1732_v52 }
 0x604   :  { %v1401_v53 = vpop.eup %1400 }
 0x605   :  { %408 = vrot.lane.b32.xlu2 %v1401_v53, %s1494_s11 }
 0x60d   :  { %57 = vperm.xlu2 %1357, %v34_v39  }
 0x65f   :  { %v409_v54 = vpop.permute.xlu2 %408 }
 0x660   :  { %v411_v55 = vmul.f32 %v409_v54, %v392_v40 }
 0x661   :  { %v447_v56 = vpop.permute.xlu1 %446 }
 0x662   :  { %v449_v57 = vmul.f32 %v447_v56, %v430_v44  ;;  %496 = vrot.lane.b32.xlu1 %v411_v55, %s1495_s12 }
 0x664   :  { %451 = vrot.lane.b32.xlu0 %v449_v57, %s1495_s12 }
 0x667   :  { %v58_v59 = vpop.permute.xlu2 %57 }
 0x668   :  { %v86_v60 = vmul.f32 %v1548_v2, %v58_v59 }
 0x66a   :  { %v98_v62 = vadd.f32 %v1553_v3, %v86_v60 }
 0x6d4   :  { %v497_v43 = vpop.permute.xlu1 %496 }
 0x6d5   :  { %1325 = vmatmul.msk.f32.vlgmr.msra.gmra.mxu0 %vm160_vm4, %v497_v43 }
 0x6d6   :  { %v452_v58 = vpop.permute.xlu0 %451  ;;  %928 = vmatpush.msra.mxu0 %v1586_v30 }
 0x6d7   :  { %1323 = vmatmul.msk.f32.vlgmr.msrb.gmra.mxu2 %vm160_vm4, %v452_v58  ;;  %1324 = vmatmul.msk.f32.vlgmr.msrb.gmra.mxu3 %vm160_vm4, %v452_v58 }
 0x6d8   :  { %806 = vmatpush.msrb.mxu2 %v1570_v27  ;;  %908 = vmatpush.msrb.mxu3 %v1581_v29 }
 0x6d9   :  { %929 = vmatpush.msra.mxu0 %v1603_v33 }
 0x6da   :  { %807 = vmatpush.msrb.mxu2 %v1575_v28  ;;  %909 = vmatpush.msrb.mxu3 %v1598_v32 }
 0x6db   :  { %930 = vmatpush.msra.mxu0 %v1614_v35 }
 0x6dc   :  { %808 = vmatpush.msrb.mxu2 %v1591_v31  ;;  %910 = vmatpush.msrb.mxu3 %v1609_v34 }
 0x6dd   :  { %931 = vmatpush.msra.mxu0 %v1636_v38 }
 0x6de   :  { %809 = vmatpush.msrb.mxu2 %v1620_v36  ;;  %911 = vmatpush.msrb.mxu3 %v1628_v37 }
 0x752   :  { %v517_v61 = vpop.f32.mrf.mxu0 }
 0x75a   :  { %v472_v63 = vpop.f32.mrf.mxu2  ;;  %v492_v0 = vpop.f32.mrf.mxu3 }
 0x75b   :  { %v559_v1 = vadd.f32 %v472_v63, %v98_v62  ;;  %v520_v4 = vadd.f32 %v517_v61, %v492_v0 }
 0x75d   :  { %1402 = vtanh.f32 %v559_v1  ;;  %v521_v5 = vadd.f32 %v1683_v48, %v520_v4  ;;  %v1327_v8 = vmul.f32 -1.442695, %v559_v1 }
 0x75f   :  { %1404 = vtanh.f32 %v521_v5  ;;  %v1326_v9 = vmul.f32 -1.442695, %v521_v5 }
 0x760   :  { %1406 = vpow2.f32 %v1327_v8 }
 0x761   :  { %1408 = vpow2.f32 %v1326_v9 }
 0x763   :  { %v1403_v6 = vpop.eup %1402 }
 0x764   :  { %582 = vrot.lane.b32.xlu1 %v1403_v6, %s1494_s11 }
 0x765   :  { %v1405_v7 = vpop.eup %1404 }
 0x766   :  { %544 = vrot.lane.b32.xlu0 %v1405_v7, %s1494_s11  ;;  %v1407_v10 = vpop.eup %1406 }
 0x767   :  { %v1409_v11 = vpop.eup %1408  ;;  %v563_v12 = vadd.f32 1.0, %v1407_v10 }
 0x768   :  { %v525_v13 = vadd.f32 1.0, %v1409_v11 }
 0x769   :  { %1410 = vrcp.f32 %v563_v12  ;;  %v575_v23 = vand.u32 2147483648, %v563_v12  ;;  %vm569_vm7 = vweird.f32 %v563_v12  ;;  %v573_v24 = vand.u32 2147483647, %v563_v12 }
 0x76a   :  { %1412 = vrcp.f32 %v525_v13  ;;  %v537_v41 = vand.u32 2147483648, %v525_v13  ;;  %vm531_vm10 = vweird.f32 %v525_v13  ;;  %v535_v44 = vand.u32 2147483647, %v525_v13 }
 0x76b   :  { %v576_v42 = vor.u32 1.1754944e-38, %v575_v23  ;;  %vm574_vm11 = vcmp.eq.f32.partialorder %v573_v24, 8.507059e+37 }
 0x76c   :  { %v538_v50 = vor.u32 1.1754944e-38, %v537_v41  ;;  %vm536_vm13 = vcmp.eq.f32.partialorder %v535_v44, 8.507059e+37 }
 0x76f   :  { %v1411_v14 = vpop.eup %1410 }
 0x770   :  { %v1413_v15 = vpop.eup %1412  ;;  %v565_v16 = vmul.f32 %v1411_v14, %v563_v12  ;;  %vm570_vm6 = vweird.f32 %v1411_v14 }
 0x771   :  { %v527_v17 = vmul.f32 %v1413_v15, %v525_v13  ;;  %vm571_vm8 = vmor %vm569_vm7, %vm570_vm6  ;;  %vm532_vm9 = vweird.f32 %v1413_v15 }
 0x772   :  { %v566_v18 = vsub.f32 1.0, %v565_v16  ;;  %vm533_vm12 = vmor %vm531_vm10, %vm532_vm9 }
 0x773   :  { %v528_v19 = vsub.f32 1.0, %v527_v17 }
 0x774   :  { %v567_v20 = vmul.f32 %v1411_v14, %v566_v18 }
 0x775   :  { %v529_v21 = vmul.f32 %v1413_v15, %v528_v19 }
 0x776   :  { %v568_v22 = vadd.f32 %v1411_v14, %v567_v20 }
 0x777   :  { %v530_v26 = vadd.f32 %v1413_v15, %v529_v21 }
 0x778   :  { %v572_v40 = vsel %vm571_vm8, %v1411_v14, %v568_v22 }
 0x779   :  { %v577_v45 = vsel %vm574_vm11, %v576_v42, %v572_v40  ;;  %v534_v46 = vsel %vm533_vm12, %v1413_v15, %v530_v26 }
 0x77a   :  { %v539_v53 = vsel %vm536_vm13, %v538_v50, %v534_v46  ;;  %v580_v43 = vmul.f32 %v577_v45, %v1727_v47 }
 0x77b   :  { %v542_v54 = vmul.f32 %v539_v53, %v1732_v52  ;;  %v35_v52 = vld [vmem:[%s1934_s0 + $0x20] sm:$0xff] }
 0x7d6   :  { %v583_v25 = vpop.permute.xlu1 %582 }
 0x7d7   :  { %v585_v49 = vmul.f32 %v583_v25, %v577_v45 }
 0x7d8   :  { %v545_v51 = vpop.permute.xlu0 %544 }
 0x7d9   :  { %587 = vrot.lane.b32.xlu0 %v585_v49, %s1495_s12  ;;  %v547_v39 = vmul.f32 %v545_v51, %v539_v53 }
 0x7db   :  { %549 = vrot.lane.b32.xlu2 %v547_v39, %s1495_s12 }
 0x835   :  { %v550_v55 = vpop.permute.xlu2 %549 }
 0x836   :  { %v1764_v56 = vadd.f32 %v550_v55, %v542_v54 }
 0x838   :  { %1414 = vtanh.f32 %v1764_v56 }
 0x83e   :  { %v1415_v57 = vpop.eup %1414 }
 0x83f   :  { %555 = vrot.lane.b32.xlu1 %v1415_v57, %s1494_s11 }
 0x84b   :  { %v588_v58 = vpop.permute.xlu0 %587 }
 0x84c   :  { %v1769_v59 = vadd.f32 %v588_v58, %v580_v43 }
 0x84e   :  { %1416 = vtanh.f32 %v1769_v59 }
 0x854   :  { %v1417_v60 = vpop.eup %1416 }
 0x855   :  { %593 = vrot.lane.b32.xlu2 %v1417_v60, %s1494_s11 }
 0x85d   :  { %62 = vperm.xlu2 %1357, %v35_v52  }
 0x8af   :  { %v594_v61 = vpop.permute.xlu2 %593 }
 0x8b0   :  { %v596_v62 = vmul.f32 %v594_v61, %v577_v45 }
 0x8b1   :  { %v556_v63 = vpop.permute.xlu1 %555 }
 0x8b2   :  { %598 = vrot.lane.b32.xlu0 %v596_v62, %s1495_s12  ;;  %v558_v0 = vmul.f32 %v556_v63, %v539_v53 }
 0x8b4   :  { %643 = vrot.lane.b32.xlu1 %v558_v0, %s1495_s12 }
 0x924   :  { %v599_v47 = vpop.permute.xlu0 %598 }
 0x925   :  { %1328 = vmatmul.msk.f32.vlgmr.msra.gmra.mxu1 %vm160_vm4, %v599_v47  ;;  %1329 = vmatmul.msk.f32.vlgmr.msra.gmra.mxu2 %vm160_vm4, %v599_v47 }
 0x926   :  { %953 = vmatpush.msra.mxu1 %v1570_v27  ;;  %1055 = vmatpush.msra.mxu2 %v1581_v29  ;;  %v644_v1 = vpop.permute.xlu1 %643  ;;  %v63_v29 = vpop.permute.xlu2 %62 }
 0x927   :  { %1330 = vmatmul.msk.f32.vlgmr.msra.gmra.mxu3 %vm160_vm4, %v644_v1  ;;  %v87_v4 = vmul.f32 %v1548_v2, %v63_v29 }
 0x928   :  { %954 = vmatpush.msra.mxu1 %v1575_v28  ;;  %1075 = vmatpush.msra.mxu3 %v1586_v30 }
 0x929   :  { %1056 = vmatpush.msra.mxu2 %v1598_v32  ;;  %v99_v5 = vadd.f32 %v1553_v3, %v87_v4 }
 0x92a   :  { %955 = vmatpush.msra.mxu1 %v1591_v31  ;;  %1076 = vmatpush.msra.mxu3 %v1603_v33 }
 0x92b   :  { %1057 = vmatpush.msra.mxu2 %v1609_v34 }
 0x92c   :  { %956 = vmatpush.msra.mxu1 %v1620_v36  ;;  %1077 = vmatpush.msra.mxu3 %v1614_v35 }
 0x92d   :  { %1058 = vmatpush.msra.mxu2 %v1628_v37 }
 0x92e   :  { %1078 = vmatpush.msra.mxu3 %v1636_v38 }
 0x9a2   :  { %v619_v32 = vpop.f32.mrf.mxu1 }
 0x9a3   :  { %v706_v6 = vadd.f32 %v619_v32, %v99_v5 }
 0x9a5   :  { %1418 = vtanh.f32 %v706_v6  ;;  %v1332_v11 = vmul.f32 -1.442695, %v706_v6 }
 0x9a8   :  { %v639_v8 = vpop.f32.mrf.mxu2 }
 0x9aa   :  { %v664_v9 = vpop.f32.mrf.mxu3 }
 0x9ab   :  { %v1419_v7 = vpop.eup %1418  ;;  %v667_v34 = vadd.f32 %v664_v9, %v639_v8 }
 0x9ac   :  { %729 = vrot.lane.b32.xlu0 %v1419_v7, %s1494_s11 }
 0x9ad   :  { %v668_v10 = vadd.f32 %v1683_v48, %v667_v34 }
 0x9af   :  { %1420 = vtanh.f32 %v668_v10  ;;  %v1331_v13 = vmul.f32 -1.442695, %v668_v10 }
 0x9b0   :  { %1422 = vpow2.f32 %v1332_v11 }
 0x9b1   :  { %1424 = vpow2.f32 %v1331_v13 }
 0x9b5   :  { %v1421_v37 = vpop.eup %1420 }
 0x9b6   :  { %691 = vrot.lane.b32.xlu1 %v1421_v37, %s1494_s11  ;;  %v1423_v12 = vpop.eup %1422 }
 0x9b7   :  { %v710_v14 = vadd.f32 1.0, %v1423_v12  ;;  %v1425_v15 = vpop.eup %1424 }
 0x9b8   :  { %v672_v17 = vadd.f32 1.0, %v1425_v15 }
 0x9b9   :  { %1426 = vrcp.f32 %v710_v14  ;;  %v722_v24 = vand.u32 2147483648, %v710_v14  ;;  %vm716_vm15 = vweird.f32 %v710_v14  ;;  %v720_v26 = vand.u32 2147483647, %v710_v14 }
 0x9ba   :  { %1428 = vrcp.f32 %v672_v17  ;;  %v684_v50 = vand.u32 2147483648, %v672_v17  ;;  %vm678_vm3 = vweird.f32 %v672_v17  ;;  %v682_v51 = vand.u32 2147483647, %v672_v17 }
 0x9bb   :  { %v723_v42 = vor.u32 1.1754944e-38, %v722_v24  ;;  %vm721_vm1 = vcmp.eq.f32.partialorder %v720_v26, 8.507059e+37 }
 0x9bc   :  { %v685_v39 = vor.u32 1.1754944e-38, %v684_v50  ;;  %vm683_vm6 = vcmp.eq.f32.partialorder %v682_v51, 8.507059e+37 }
 0x9bf   :  { %v1427_v16 = vpop.eup %1426 }
 0x9c0   :  { %v712_v18 = vmul.f32 %v1427_v16, %v710_v14  ;;  %v1429_v21 = vpop.eup %1428  ;;  %vm717_vm14 = vweird.f32 %v1427_v16 }
 0x9c1   :  { %v674_v23 = vmul.f32 %v1429_v21, %v672_v17  ;;  %vm718_vm0 = vmor %vm716_vm15, %vm717_vm14  ;;  %vm679_vm2 = vweird.f32 %v1429_v21 }
 0x9c2   :  { %v713_v19 = vsub.f32 1.0, %v712_v18  ;;  %vm680_vm5 = vmor %vm678_vm3, %vm679_vm2 }
 0x9c3   :  { %v675_v41 = vsub.f32 1.0, %v674_v23 }
 0x9c4   :  { %v714_v20 = vmul.f32 %v1427_v16, %v713_v19 }
 0x9c5   :  { %v676_v46 = vmul.f32 %v1429_v21, %v675_v41 }
 0x9c6   :  { %v715_v22 = vadd.f32 %v1427_v16, %v714_v20 }
 0x9c7   :  { %v677_v49 = vadd.f32 %v1429_v21, %v676_v46 }
 0x9c8   :  { %v719_v40 = vsel %vm718_vm0, %v1427_v16, %v715_v22 }
 0x9c9   :  { %v724_v25 = vsel %vm721_vm1, %v723_v42, %v719_v40  ;;  %v681_v53 = vsel %vm680_vm5, %v1429_v21, %v677_v49 }
 0x9ca   :  { %v686_v55 = vsel %vm683_vm6, %v685_v39, %v681_v53  ;;  %v727_v43 = vmul.f32 %v724_v25, %v1769_v59  ;;  %v36_v59 = vld [vmem:[%s1934_s0 + $0x28] sm:$0xff] }
 0x9cb   :  { %v689_v61 = vmul.f32 %v686_v55, %v1764_v56 }
 0xa1e   :  { %v730_v44 = vpop.permute.xlu0 %729 }
 0xa1f   :  { %v732_v45 = vmul.f32 %v730_v44, %v724_v25 }
 0xa21   :  { %734 = vrot.lane.b32.xlu2 %v732_v45, %s1495_s12 }
 0xa28   :  { %v692_v54 = vpop.permute.xlu1 %691 }
 0xa29   :  { %v694_v57 = vmul.f32 %v692_v54, %v686_v55 }
 0xa2b   :  { %696 = vrot.lane.b32.xlu0 %v694_v57, %s1495_s12 }
 0xa7b   :  { %v735_v58 = vpop.permute.xlu2 %734 }
 0xa7c   :  { %v1801_v60 = vadd.f32 %v735_v58, %v727_v43  ;;  %v37_v58 = vld [vmem:[%s1934_s0 + $0x30] sm:$0xff] }
 0xa7e   :  { %1430 = vtanh.f32 %v1801_v60 }
 0xa84   :  { %v1431_v52 = vpop.eup %1430 }
 0xa85   :  { %740 = vrot.lane.b32.xlu1 %v1431_v52, %s1494_s11 }
 0xa9d   :  { %v697_v62 = vpop.permute.xlu0 %696 }
 0xa9e   :  { %v1806_v63 = vadd.f32 %v697_v62, %v689_v61 }
 0xaa0   :  { %1432 = vtanh.f32 %v1806_v63 }
 0xaa6   :  { %v1433_v0 = vpop.eup %1432 }
 0xaa7   :  { %702 = vrot.lane.b32.xlu2 %v1433_v0, %s1494_s11 }
 0xaaf   :  { %67 = vperm.xlu2 %1357, %v36_v59  }
 0xaf7   :  { %v741_v47 = vpop.permute.xlu1 %740 }
 0xaf8   :  { %v743_v1 = vmul.f32 %v741_v47, %v724_v25  ;;  %v1858_v47 = vld [vmem:[%s1935_s1] ss:$0 sm:$0xff] }
 0xafa   :  { %745 = vrot.lane.b32.xlu0 %v743_v1, %s1495_s12 }
 0xb01   :  { %v703_v29 = vpop.permute.xlu2 %702 }
 0xb02   :  { %v705_v4 = vmul.f32 %v703_v29, %v686_v55  ;;  %v1864_v29 = vld [vmem:[%s1936_s2] ss:$0 sm:$0xff] }
 0xb04   :  { %790 = vrot.lane.b32.xlu1 %v705_v4, %s1495_s12 }
 0xb6c   :  { %v746_v56 = vpop.permute.xlu0 %745 }
 0xb6d   :  { %1333 = vmatmul.msk.f32.vlgmr.msrb.gmra.mxu0 %vm160_vm4, %v746_v56  ;;  %1334 = vmatmul.msk.f32.vlgmr.msrb.gmra.mxu1 %vm160_vm4, %v746_v56 }
 0xb6e   :  { %1100 = vmatpush.msrb.mxu0 %v1570_v27  ;;  %1202 = vmatpush.msrb.mxu1 %v1586_v30  ;;  %v68_v30 = vpop.permute.xlu2 %67 }
 0xb70   :  { %1101 = vmatpush.msrb.mxu0 %v1575_v28  ;;  %1203 = vmatpush.msrb.mxu1 %v1603_v33  ;;  %v88_v33 = vmul.f32 %v1548_v2, %v68_v30 }
 0xb72   :  { %1102 = vmatpush.msrb.mxu0 %v1591_v31  ;;  %1204 = vmatpush.msrb.mxu1 %v1614_v35  ;;  %v100_v35 = vadd.f32 %v1553_v3, %v88_v33 }
 0xb74   :  { %1103 = vmatpush.msrb.mxu0 %v1620_v36  ;;  %1205 = vmatpush.msrb.mxu1 %v1636_v38 }
 0xb76   :  { %v791_v5 = vpop.permute.xlu1 %790 }
 0xb77   :  { %1335 = vmatmul.msk.f32.vlgmr.msrb.gmra.mxu2 %vm160_vm4, %v791_v5 }
 0xb78   :  { %1227 = vmatpush.msrb.mxu2 %v1570_v27 }
 0xb7a   :  { %1228 = vmatpush.msrb.mxu2 %v1575_v28 }
 0xb7c   :  { %1229 = vmatpush.msrb.mxu2 %v1591_v31 }
 0xb7e   :  { %1230 = vmatpush.msrb.mxu2 %v1620_v36 }
 0xbea   :  { %v766_v32 = vpop.f32.mrf.mxu0  ;;  %v786_v7 = vpop.f32.mrf.mxu1 }
 0xbeb   :  { %v853_v6 = vadd.f32 %v766_v32, %v100_v35 }
 0xbed   :  { %1434 = vtanh.f32 %v853_v6  ;;  %v1337_v36 = vmul.f32 -1.442695, %v853_v6 }
 0xbf3   :  { %v1435_v38 = vpop.eup %1434 }
 0xbf4   :  { %876 = vrot.lane.b32.xlu0 %v1435_v38, %s1494_s11 }
 0xbfa   :  { %v811_v8 = vpop.f32.mrf.mxu2 }
 0xbfb   :  { %v814_v27 = vadd.f32 %v811_v8, %v786_v7 }
 0xbfd   :  { %v815_v28 = vadd.f32 %v1683_v48, %v814_v27 }
 0xbff   :  { %1436 = vtanh.f32 %v815_v28  ;;  %v1336_v3 = vmul.f32 -1.442695, %v815_v28 }
 0xc00   :  { %1438 = vpow2.f32 %v1337_v36 }
 0xc05   :  { %v1437_v31 = vpop.eup %1436 }
 0xc06   :  { %838 = vrot.lane.b32.xlu1 %v1437_v31, %s1494_s11  ;;  %v1439_v2 = vpop.eup %1438 }
 0xc07   :  { %v857_v9 = vadd.f32 1.0, %v1439_v2 }
 0xc09   :  { %1440 = vrcp.f32 %v857_v9  ;;  %v869_v15 = vand.u32 2147483648, %v857_v9  ;;  %vm863_vm8 = vweird.f32 %v857_v9  ;;  %v867_v16 = vand.u32 2147483647, %v857_v9 }
 0xc0a   :  { %1442 = vpow2.f32 %v1336_v3 }
 0xc0b   :  { %v870_v19 = vor.u32 1.1754944e-38, %v869_v15  ;;  %vm868_vm10 = vcmp.eq.f32.partialorder %v867_v16, 8.507059e+37 }
 0xc0f   :  { %v1441_v34 = vpop.eup %1440 }
 0xc10   :  { %v859_v10 = vmul.f32 %v1441_v34, %v857_v9  ;;  %v1443_v37 = vpop.eup %1442  ;;  %vm864_vm7 = vweird.f32 %v1441_v34 }
 0xc11   :  { %v819_v12 = vadd.f32 1.0, %v1443_v37  ;;  %vm865_vm9 = vmor %vm863_vm8, %vm864_vm7 }
 0xc12   :  { %v860_v11 = vsub.f32 1.0, %v859_v10 }
 0xc13   :  { %1444 = vrcp.f32 %v819_v12  ;;  %v831_v41 = vand.u32 2147483648, %v819_v12  ;;  %vm825_vm12 = vweird.f32 %v819_v12  ;;  %v829_v42 = vand.u32 2147483647, %v819_v12 }
 0xc14   :  { %v861_v13 = vmul.f32 %v1441_v34, %v860_v11 }
 0xc15   :  { %v832_v25 = vor.u32 1.1754944e-38, %v831_v41  ;;  %vm830_vm14 = vcmp.eq.f32.partialorder %v829_v42, 8.507059e+37 }
 0xc16   :  { %v862_v14 = vadd.f32 %v1441_v34, %v861_v13 }
 0xc18   :  { %v866_v17 = vsel %vm865_vm9, %v1441_v34, %v862_v14 }
 0xc19   :  { %v1445_v18 = vpop.eup %1444  ;;  %v871_v21 = vsel %vm868_vm10, %v870_v19, %v866_v17 }
 0xc1a   :  { %v821_v23 = vmul.f32 %v1445_v18, %v819_v12  ;;  %vm826_vm11 = vweird.f32 %v1445_v18  ;;  %v874_v50 = vmul.f32 %v871_v21, %v1801_v60 }
 0xc1b   :  { %vm827_vm13 = vmor %vm825_vm12, %vm826_vm11 }
 0xc1c   :  { %v822_v24 = vsub.f32 1.0, %v821_v23 }
 0xc1e   :  { %v823_v26 = vmul.f32 %v1445_v18, %v822_v24 }
 0xc20   :  { %v824_v40 = vadd.f32 %v1445_v18, %v823_v26 }
 0xc22   :  { %v828_v44 = vsel %vm827_vm13, %v1445_v18, %v824_v40 }
 0xc23   :  { %v833_v46 = vsel %vm830_vm14, %v832_v25, %v828_v44 }
 0xc24   :  { %v836_v54 = vmul.f32 %v833_v46, %v1806_v63 }
 0xc66   :  { %v877_v20 = vpop.permute.xlu0 %876 }
 0xc67   :  { %v879_v22 = vmul.f32 %v877_v20, %v871_v21 }
 0xc69   :  { %881 = vrot.lane.b32.xlu2 %v879_v22, %s1495_s12 }
 0xc78   :  { %v839_v45 = vpop.permute.xlu1 %838 }
 0xc79   :  { %v841_v49 = vmul.f32 %v839_v45, %v833_v46 }
 0xc7b   :  { %843 = vrot.lane.b32.xlu0 %v841_v49, %s1495_s12 }
 0xcc3   :  { %v882_v51 = vpop.permute.xlu2 %881 }
 0xcc4   :  { %v1838_v53 = vadd.f32 %v882_v51, %v874_v50 }
 0xcc6   :  { %1446 = vtanh.f32 %v1838_v53 }
 0xccc   :  { %v1447_v39 = vpop.eup %1446 }
 0xccd   :  { %887 = vrot.lane.b32.xlu1 %v1447_v39, %s1494_s11 }
 0xced   :  { %v844_v55 = vpop.permute.xlu0 %843 }
 0xcee   :  { %v1843_v57 = vadd.f32 %v844_v55, %v836_v54 }
 0xcf0   :  { %1448 = vtanh.f32 %v1843_v57 }
 0xcf6   :  { %v1449_v43 = vpop.eup %1448 }
 0xcf7   :  { %849 = vrot.lane.b32.xlu2 %v1449_v43, %s1494_s11 }
 0xcff   :  { %72 = vperm.xlu2 %1357, %v37_v58  }
 0xd3f   :  { %v888_v60 = vpop.permute.xlu1 %887 }
 0xd40   :  { %v890_v52 = vmul.f32 %v888_v60, %v871_v21 }
 0xd42   :  { %892 = vrot.lane.b32.xlu0 %v890_v52, %s1495_s12 }
 0xd51   :  { %v850_v61 = vpop.permute.xlu2 %849 }
 0xd52   :  { %v852_v62 = vmul.f32 %v850_v61, %v833_v46 }
 0xd54   :  { %937 = vrot.lane.b32.xlu1 %v852_v62, %s1495_s12 }
 0xd59   :  { %v73_v59 = vpop.permute.xlu2 %72 }
 0xd5a   :  { %v89_v1 = vmul.f32 %v1858_v47, %v73_v59 }
 0xd5c   :  { %v101_v4 = vadd.f32 %v1864_v29, %v89_v1 }
 0xdb4   :  { %v893_v63 = vpop.permute.xlu0 %892 }
 0xdb5   :  { %1338 = vmatmul.msk.f32.vlgmr.msrb.gmra.mxu3 %vm160_vm4, %v893_v63  ;;  %1339 = vmatmul.msk.f32.vlgmr.msra.gmra.mxu0 %vm160_vm4, %v893_v63 }
 0xdc6   :  { %v938_v0 = vpop.permute.xlu1 %937 }
 0xdc7   :  { %1340 = vmatmul.msk.f32.vlgmr.msra.gmra.mxu1 %vm160_vm4, %v938_v0 }
 0xe32   :  { %v933_v33 = vpop.f32.mrf.mxu0 }
 0xe38   :  { %v913_v56 = vpop.f32.mrf.mxu3 }
 0xe39   :  { %v1000_v5 = vadd.f32 %v913_v56, %v101_v4  ;;  %v1896_v56 = vld [vmem:[%s1939_s5] ss:$0 sm:$0xff] }
 0xe3b   :  { %1450 = vtanh.f32 %v1000_v5  ;;  %v1342_v7 = vmul.f32 -1.442695, %v1000_v5 }
 0xe41   :  { %v1451_v30 = vpop.eup %1450 }
 0xe42   :  { %1023 = vrot.lane.b32.xlu0 %v1451_v30, %s1494_s11 }
 0xe44   :  { %v958_v35 = vpop.f32.mrf.mxu1 }
 0xe45   :  { %v961_v32 = vadd.f32 %v958_v35, %v933_v33 }
 0xe47   :  { %v962_v6 = vadd.f32 %v1683_v48, %v961_v32 }
 0xe49   :  { %1452 = vtanh.f32 %v962_v6  ;;  %v1341_v28 = vmul.f32 -1.442695, %v962_v6 }
 0xe4a   :  { %1454 = vpow2.f32 %v1342_v7 }
 0xe4f   :  { %v1453_v38 = vpop.eup %1452 }
 0xe50   :  { %985 = vrot.lane.b32.xlu1 %v1453_v38, %s1494_s11  ;;  %v1455_v8 = vpop.eup %1454 }
 0xe51   :  { %v1004_v27 = vadd.f32 1.0, %v1455_v8 }
 0xe53   :  { %1456 = vrcp.f32 %v1004_v27  ;;  %v1016_v37 = vand.u32 2147483648, %v1004_v27  ;;  %vm1010_vm0 = vweird.f32 %v1004_v27  ;;  %v1014_v11 = vand.u32 2147483647, %v1004_v27 }
 0xe54   :  { %1458 = vpow2.f32 %v1341_v28 }
 0xe55   :  { %v1017_v14 = vor.u32 1.1754944e-38, %v1016_v37  ;;  %vm1015_vm2 = vcmp.eq.f32.partialorder %v1014_v11, 8.507059e+37 }
 0xe59   :  { %v1457_v31 = vpop.eup %1456 }
 0xe5a   :  { %v1459_v36 = vpop.eup %1458  ;;  %v1006_v2 = vmul.f32 %v1457_v31, %v1004_v27  ;;  %vm1011_vm15 = vweird.f32 %v1457_v31 }
 0xe5b   :  { %v966_v9 = vadd.f32 1.0, %v1459_v36  ;;  %vm1012_vm1 = vmor %vm1010_vm0, %vm1011_vm15 }
 0xe5c   :  { %v1007_v3 = vsub.f32 1.0, %v1006_v2 }
 0xe5d   :  { %1460 = vrcp.f32 %v966_v9  ;;  %v978_v21 = vand.u32 2147483648, %v966_v9  ;;  %vm972_vm5 = vweird.f32 %v966_v9  ;;  %v976_v22 = vand.u32 2147483647, %v966_v9 }
 0xe5e   :  { %v1008_v34 = vmul.f32 %v1457_v31, %v1007_v3 }
 0xe5f   :  { %v979_v24 = vor.u32 1.1754944e-38, %v978_v21  ;;  %vm977_vm7 = vcmp.eq.f32.partialorder %v976_v22, 8.507059e+37 }
 0xe60   :  { %v1009_v10 = vadd.f32 %v1457_v31, %v1008_v34 }
 0xe62   :  { %v1013_v12 = vsel %vm1012_vm1, %v1457_v31, %v1009_v10 }
 0xe63   :  { %v1461_v48 = vpop.eup %1460  ;;  %v1018_v16 = vsel %vm1015_vm2, %v1017_v14, %v1013_v12 }
 0xe64   :  { %v968_v13 = vmul.f32 %v1461_v48, %v966_v9  ;;  %vm973_vm3 = vweird.f32 %v1461_v48  ;;  %v1021_v42 = vmul.f32 %v1018_v16, %v1838_v53  ;;  %v38_v53 = vld [vmem:[%s1934_s0 + $0x38] sm:$0xff] }
 0xe65   :  { %vm974_vm6 = vmor %vm972_vm5, %vm973_vm3  ;;  %vm1307_vm5 = vcmask 7168  }
 0xe66   :  { %v969_v18 = vsub.f32 1.0, %v968_v13 }
 0xe68   :  { %v970_v19 = vmul.f32 %v1461_v48, %v969_v18 }
 0xe6a   :  { %v971_v20 = vadd.f32 %v1461_v48, %v970_v19 }
 0xe6c   :  { %v975_v23 = vsel %vm974_vm6, %v1461_v48, %v971_v20 }
 0xe6d   :  { %v980_v40 = vsel %vm977_vm7, %v979_v24, %v975_v23 }
 0xe6e   :  { %v983_v46 = vmul.f32 %v980_v40, %v1843_v57 }
 0xeb4   :  { %v1024_v15 = vpop.permute.xlu0 %1023 }
 0xeb5   :  { %v1026_v17 = vmul.f32 %v1024_v15, %v1018_v16 }
 0xeb7   :  { %1028 = vrot.lane.b32.xlu2 %v1026_v17, %s1495_s12 }
 0xec2   :  { %v986_v26 = vpop.permute.xlu1 %985 }
 0xec3   :  { %v988_v41 = vmul.f32 %v986_v26, %v980_v40 }
 0xec5   :  { %990 = vrot.lane.b32.xlu0 %v988_v41, %s1495_s12 }
 0xf11   :  { %v1029_v44 = vpop.permute.xlu2 %1028 }
 0xf12   :  { %v1873_v25 = vadd.f32 %v1029_v44, %v1021_v42 }
 0xf14   :  { %1462 = vtanh.f32 %v1873_v25 }
 0xf1a   :  { %v1463_v45 = vpop.eup %1462 }
 0xf1b   :  { %1034 = vrot.lane.b32.xlu1 %v1463_v45, %s1494_s11 }
 0xf37   :  { %v991_v49 = vpop.permute.xlu0 %990 }
 0xf38   :  { %v1878_v50 = vadd.f32 %v991_v49, %v983_v46 }
 0xf3a   :  { %1464 = vtanh.f32 %v1878_v50 }
 0xf40   :  { %v1465_v51 = vpop.eup %1464 }
 0xf41   :  { %996 = vrot.lane.b32.xlu2 %v1465_v51, %s1494_s11 }
 0xf49   :  { %77 = vperm.xlu2 %1357, %v38_v53  }
 0xf8d   :  { %v1035_v39 = vpop.permute.xlu1 %1034 }
 0xf8e   :  { %v1037_v54 = vmul.f32 %v1035_v39, %v1018_v16 }
 0xf90   :  { %1039 = vrot.lane.b32.xlu0 %v1037_v54, %s1495_s12 }
 0xf9b   :  { %v997_v55 = vpop.permute.xlu2 %996 }
 0xf9c   :  { %v999_v43 = vmul.f32 %v997_v55, %v980_v40 }
 0xf9e   :  { %1084 = vrot.lane.b32.xlu1 %v999_v43, %s1495_s12 }
 0xfa3   :  { %v78_v60 = vpop.permute.xlu2 %77 }
 0xfa4   :  { %v90_v52 = vmul.f32 %v1858_v47, %v78_v60 }
 0xfa6   :  { %v102_v61 = vadd.f32 %v1864_v29, %v90_v52 }
0x1002   :  { %v1040_v57 = vpop.permute.xlu0 %1039 }
0x1003   :  { %1343 = vmatmul.msk.f32.vlgmr.msra.gmra.mxu2 %vm160_vm4, %v1040_v57  ;;  %1344 = vmatmul.msk.f32.vlgmr.msra.gmra.mxu3 %vm160_vm4, %v1040_v57 }
0x1010   :  { %v1085_v58 = vpop.permute.xlu1 %1084 }
0x1011   :  { %1345 = vmatmul.msk.f32.vlgmr.msrb.gmra.mxu0 %vm160_vm4, %v1085_v58 }
0x1086   :  { %v1060_v62 = vpop.f32.mrf.mxu2  ;;  %v1080_v59 = vpop.f32.mrf.mxu3 }
0x1087   :  { %v1147_v63 = vadd.f32 %v1060_v62, %v102_v61 }
0x1089   :  { %1466 = vtanh.f32 %v1147_v63  ;;  %v1347_v29 = vmul.f32 -1.442695, %v1147_v63 }
0x108e   :  { %v1105_v1 = vpop.f32.mrf.mxu0 }
0x108f   :  { %v1467_v0 = vpop.eup %1466  ;;  %v1108_v4 = vadd.f32 %v1105_v1, %v1080_v59 }
0x1090   :  { %1170 = vrot.lane.b32.xlu1 %v1467_v0, %s1494_s11 }
0x1091   :  { %v1109_v5 = vadd.f32 %v1896_v56, %v1108_v4 }
0x1093   :  { %1468 = vtanh.f32 %v1109_v5  ;;  %v1346_v33 = vmul.f32 -1.442695, %v1109_v5 }
0x1094   :  { %1470 = vpow2.f32 %v1347_v29 }
0x1095   :  { %1472 = vpow2.f32 %v1346_v33 }
0x1099   :  { %v1469_v47 = vpop.eup %1468 }
0x109a   :  { %1132 = vrot.lane.b32.xlu0 %v1469_v47, %s1494_s11  ;;  %v1471_v30 = vpop.eup %1470 }
0x109b   :  { %v1151_v35 = vadd.f32 1.0, %v1471_v30  ;;  %v1473_v32 = vpop.eup %1472 }
0x109c   :  { %v1113_v38 = vadd.f32 1.0, %v1473_v32  ;;  %v1277_v32 = vld [vmem:[%s1940_s6 + $0x18] sm:$0xff] }
0x109d   :  { %1474 = vrcp.f32 %v1151_v35  ;;  %v1163_v2 = vand.u32 2147483648, %v1151_v35  ;;  %vm1157_vm9 = vweird.f32 %v1151_v35  ;;  %v1161_v9 = vand.u32 2147483647, %v1151_v35  ;;  %1299 = vmatpush.msrb.mxu3 %v1277_v32 }
0x109e   :  { %1476 = vrcp.f32 %v1113_v38  ;;  %v1125_v14 = vand.u32 2147483648, %v1113_v38  ;;  %vm1119_vm13 = vweird.f32 %v1113_v38  ;;  %v1123_v15 = vand.u32 2147483647, %v1113_v38 }
0x109f   :  { %v1164_v10 = vor.u32 1.1754944e-38, %v1163_v2  ;;  %vm1162_vm11 = vcmp.eq.f32.partialorder %v1161_v9, 8.507059e+37 }
0x10a0   :  { %v1126_v17 = vor.u32 1.1754944e-38, %v1125_v14  ;;  %vm1124_vm15 = vcmp.eq.f32.partialorder %v1123_v15, 8.507059e+37 }
0x10a3   :  { %v1475_v6 = vpop.eup %1474 }
0x10a4   :  { %v1153_v7 = vmul.f32 %v1475_v6, %v1151_v35  ;;  %v1477_v28 = vpop.eup %1476  ;;  %vm1158_vm8 = vweird.f32 %v1475_v6 }
0x10a5   :  { %v1115_v36 = vmul.f32 %v1477_v28, %v1113_v38  ;;  %vm1159_vm10 = vmor %vm1157_vm9, %vm1158_vm8  ;;  %vm1120_vm12 = vweird.f32 %v1477_v28  ;;  %v1275_v38 = vld [vmem:[%s1940_s6 + $0x8] sm:$0xff] }
0x10a6   :  { %v1154_v8 = vsub.f32 1.0, %v1153_v7  ;;  %vm1121_vm14 = vmor %vm1119_vm13, %vm1120_vm12  ;;  %v1274_v7 = vld [vmem:[%s1940_s6] sm:$0xff] }
0x10a7   :  { %v1116_v34 = vsub.f32 1.0, %v1115_v36 }
0x10a8   :  { %v1155_v27 = vmul.f32 %v1475_v6, %v1154_v8 }
0x10a9   :  { %v1117_v12 = vmul.f32 %v1477_v28, %v1116_v34 }
0x10aa   :  { %v1156_v31 = vadd.f32 %v1475_v6, %v1155_v27 }
0x10ab   :  { %v1118_v13 = vadd.f32 %v1477_v28, %v1117_v12 }
0x10ac   :  { %v1160_v3 = vsel %vm1159_vm10, %v1475_v6, %v1156_v31  ;;  %v1276_v6 = vld [vmem:[%s1940_s6 + $0x10] sm:$0xff] }
0x10ad   :  { %v1165_v48 = vsel %vm1162_vm11, %v1164_v10, %v1160_v3  ;;  %v1122_v16 = vsel %vm1121_vm14, %v1477_v28, %v1118_v13  ;;  %1300 = vmatpush.msrb.mxu3 %v1276_v6  ;;  %v13_v28 = vstv %s1941_s7 }
0x10ae   :  { %v1127_v19 = vsel %vm1124_vm15, %v1126_v17, %v1122_v16  ;;  %v1168_v26 = vmul.f32 %v1165_v48, %v1873_v25  ;;  %14 = vst [vmem:[#allocation2] sm:$0x1] %v13_v28 }
0x10af   :  { %v1130_v21 = vmul.f32 %v1127_v19, %v1878_v50  ;;  %1301 = vmatpush.msrb.mxu3 %v1275_v38 }
0x10b1   :  { %1302 = vmatpush.msrb.mxu3 %v1274_v7 }
0x10b5   :  { %v1361_v36 = vld [vmem:[#allocation2] ss:$0 sm:$0xff] }
0x1102   :  { %v1171_v37 = vpop.permute.xlu1 %1170 }
0x1103   :  { %v1173_v11 = vmul.f32 %v1171_v37, %v1165_v48 }
0x1105   :  { %1175 = vrot.lane.b32.xlu0 %v1173_v11, %s1495_s12 }
0x110c   :  { %v1133_v18 = vpop.permute.xlu0 %1132 }
0x110d   :  { %v1135_v20 = vmul.f32 %v1133_v18, %v1127_v19 }
0x110f   :  { %1137 = vrot.lane.b32.xlu2 %v1135_v20, %s1495_s12 }
0x1169   :  { %v1138_v22 = vpop.permute.xlu2 %1137 }
0x116a   :  { %v1140_v23 = vadd.f32 %v1138_v22, %v1130_v21 }
0x116c   :  { %1478 = vtanh.f32 %v1140_v23 }
0x1172   :  { %v1479_v24 = vpop.eup %1478 }
0x1173   :  { %1143 = vrot.lane.b32.xlu1 %v1479_v24, %s1494_s11 }
0x1177   :  { %v1176_v40 = vpop.permute.xlu0 %1175 }
0x1178   :  { %v1178_v41 = vadd.f32 %v1176_v40, %v1168_v26 }
0x117a   :  { %1480 = vtanh.f32 %v1178_v41 }
0x1180   :  { %v1481_v42 = vpop.eup %1480 }
0x1181   :  { %1181 = vrot.lane.b32.xlu2 %v1481_v42, %s1494_s11 }
0x11db   :  { %v1182_v44 = vpop.permute.xlu2 %1181 }
0x11dc   :  { %v1184_v45 = vmul.f32 %v1182_v44, %v1165_v48 }
0x11de   :  { %1186 = vrot.lane.b32.xlu1 %v1184_v45, %s1495_s12 }
0x11e5   :  { %v1144_v46 = vpop.permute.xlu1 %1143 }
0x11e6   :  { %v1146_v49 = vmul.f32 %v1144_v46, %v1127_v19 }
0x11e8   :  { %1211 = vrot.lane.b32.xlu0 %v1146_v49, %s1495_s12 }
0x1250   :  { %v1187_v50 = vpop.permute.xlu1 %1186 }
0x1251   :  { %1348 = vmatmul.msk.f32.vlgmr.msrb.gmra.mxu1 %vm160_vm4, %v1187_v50 }
0x125a   :  { %v1212_v51 = vpop.permute.xlu0 %1211 }
0x125b   :  { %1349 = vmatmul.msk.f32.vlgmr.msrb.gmra.mxu2 %vm160_vm4, %v1212_v51 }
0x12ce   :  { %v1207_v25 = vpop.f32.mrf.mxu1 }
0x12de   :  { %v1232_v53 = vpop.f32.mrf.mxu2 }
0x12df   :  { %v1235_v39 = vadd.f32 %v1232_v53, %v1207_v25 }
0x12e1   :  { %v1236_v54 = vadd.f32 %v1896_v56, %v1235_v39 }
0x12e3   :  { %1482 = vtanh.f32 %v1236_v54  ;;  %v1350_v43 = vmul.f32 -1.442695, %v1236_v54 }
0x12e5   :  { %1484 = vpow2.f32 %v1350_v43 }
0x12e9   :  { %v1483_v55 = vpop.eup %1482 }
0x12ea   :  { %1259 = vrot.lane.b32.xlu2 %v1483_v55, %s1494_s11 }
0x12eb   :  { %v1485_v57 = vpop.eup %1484 }
0x12ec   :  { %v1240_v58 = vadd.f32 1.0, %v1485_v57 }
0x12ee   :  { %1486 = vrcp.f32 %v1240_v58  ;;  %v1252_v0 = vand.u32 2147483648, %v1240_v58  ;;  %vm1246_vm1 = vweird.f32 %v1240_v58  ;;  %v1250_v59 = vand.u32 2147483647, %v1240_v58 }
0x12f0   :  { %v1253_v4 = vor.u32 1.1754944e-38, %v1252_v0  ;;  %vm1251_vm3 = vcmp.eq.f32.partialorder %v1250_v59, 8.507059e+37 }
0x12f4   :  { %v1487_v60 = vpop.eup %1486 }
0x12f5   :  { %v1242_v52 = vmul.f32 %v1487_v60, %v1240_v58  ;;  %vm1247_vm0 = vweird.f32 %v1487_v60 }
0x12f6   :  { %vm1248_vm2 = vmor %vm1246_vm1, %vm1247_vm0 }
0x12f7   :  { %v1243_v61 = vsub.f32 1.0, %v1242_v52 }
0x12f9   :  { %v1244_v62 = vmul.f32 %v1487_v60, %v1243_v61 }
0x12fb   :  { %v1245_v63 = vadd.f32 %v1487_v60, %v1244_v62 }
0x12fd   :  { %v1249_v1 = vsel %vm1248_vm2, %v1487_v60, %v1245_v63 }
0x12fe   :  { %v1254_v5 = vsel %vm1251_vm3, %v1253_v4, %v1249_v1 }
0x12ff   :  { %v1257_v29 = vmul.f32 %v1254_v5, %v1140_v23 }
0x1344   :  { %v1260_v56 = vpop.permute.xlu2 %1259 }
0x1345   :  { %v1262_v47 = vmul.f32 %v1260_v56, %v1254_v5 }
0x1347   :  { %1264 = vrot.lane.b32.xlu0 %v1262_v47, %s1495_s12 }
0x13b9   :  { %v1265_v30 = vpop.permute.xlu0 %1264 }
0x13ba   :  { %v1267_v33 = vadd.f32 %v1265_v30, %v1257_v29 }
0x13bc   :  { %1488 = vtanh.f32 %v1267_v33 }
0x13c2   :  { %v1489_v35 = vpop.eup %1488 }
0x13c3   :  { %1270 = vrot.lane.b32.xlu1 %v1489_v35, %s1494_s11 }
0x1435   :  { %v1271_v8 = vpop.permute.xlu1 %1270 }
0x1436   :  { %v1273_v27 = vmul.f32 %v1271_v8, %v1254_v5 }
0x1438   :  { %1283 = vrot.lane.b32.xlu2 %v1273_v27, %s1495_s12 }
0x1492   :  { %v1284_v31 = vpop.permute.xlu2 %1283 }
0x1493   :  { %1351 = vmatmul.msk.f32.vlgmr.msrb.gmra.mxu3 %vm160_vm4, %v1284_v31 }
0x1516   :  { %v1304_v2 = vpop.f32.mrf.mxu3 }
0x1517   :  { %v1305_v9 = vadd.f32 %v1361_v36, %v1304_v2 }
0x1519   :  { %1308 = vst.msk [vmem:[%s1942_s8] sm:$0xff] %vm1307_vm5, %v1305_v9 }

</bundles_post_ra>
